<compile_context>
chip_gen: v7x
topology: tpu7x:2x2x1
jax: 0.10.0
libtpu: 0.0.40
codegen_flags: <defaults>
</compile_context>

<pallas_src>
import jax
import jax.numpy as jnp
from jax import lax
from jax.experimental import pallas as pl
from jax.experimental.pallas import tpu as pltpu


def _self_attention_kernel(x_ref, w_ref, b_ref, o_ref):
    # x_ref: (B, N, Dp) f32 — whole lane-padded input, resident in VMEM
    # w_ref: (Dp, Hp)   f32 — nn.Linear weight stored pre-transposed, zero-padded
    # b_ref: (1, Hp)    f32 — nn.Linear bias, zero-padded
    # o_ref: (B, N, Dp) f32 — lane-dense output (padding sliced off in wrapper)
    batch = x_ref.shape[0]

    # Hoist the shared operands once (not per batch element).
    w = w_ref[...]                                                   # (Dp, Hp)
    b = b_ref[...]                                                   # (1, Hp)

    # Single kernel invocation; unrolled loop over the small static batch.
    for i in range(batch):
        xi = x_ref[i]                                                # (N, Dp)

        # hidden = x W^T + b  (W already transposed; zero K-padding is exact)
        hidden = jnp.dot(xi, w, preferred_element_type=jnp.float32) + b  # (N, Hp)

        # scores = hidden @ hidden^T as a transposed-RHS matmul (no XLU transpose)
        scores = lax.dot_general(
            hidden, hidden, (((1,), (1,)), ((), ())),
            preferred_element_type=jnp.float32)                      # (N, N)

        # Numerically-stable softmax; denominator via EUP approx reciprocal.
        m = jnp.max(scores, axis=-1, keepdims=True)
        e = jnp.exp(scores - m)
        inv = pl.reciprocal(jnp.sum(e, axis=-1, keepdims=True), approx=True)
        alpha = e * inv                                              # (N, N)

        # attended = alpha @ x  (padded lanes of x are zero -> padded out lanes zero)
        o_ref[i] = jnp.dot(alpha, xi, preferred_element_type=jnp.float32)


def self_attention(x, w, b):
    """x: (batch, n, dim) f32; w: (dim, hidden) f32 (== nn.Linear W^T); b: (hidden,) f32."""
    batch, n, dim = x.shape
    hidden_dim = w.shape[1]

    LANE = 128
    dim_p = ((dim + LANE - 1) // LANE) * LANE
    hid_p = ((hidden_dim + LANE - 1) // LANE) * LANE

    # Zero-pad to lane-dense shapes (exact: padded K rows / H cols / bias are zero).
    x_p = jnp.pad(x, ((0, 0), (0, 0), (0, dim_p - dim)))
    w_p = jnp.pad(w, ((0, dim_p - dim), (0, hid_p - hidden_dim)))
    b_p = jnp.pad(b, (0, hid_p - hidden_dim)).reshape(1, hid_p)

    out_p = pl.pallas_call(
        _self_attention_kernel,
        out_shape=jax.ShapeDtypeStruct((batch, n, dim_p), x.dtype),
        in_specs=[
            pl.BlockSpec(memory_space=pltpu.MemorySpace.VMEM),
            pl.BlockSpec(memory_space=pltpu.MemorySpace.VMEM),
            pl.BlockSpec(memory_space=pltpu.MemorySpace.VMEM),
        ],
        out_specs=pl.BlockSpec(memory_space=pltpu.MemorySpace.VMEM),
    )(x_p, w_p, b_p)

    # Slice the lane padding back off.
    return out_p[:, :, :dim]


def _reference(x, w, b):
    hidden = jnp.einsum("bnd,dh->bnh", x, w) + b
    scores = jnp.einsum("bnh,bmh->bnm", hidden, hidden)
    alpha = jax.nn.softmax(scores, axis=-1)
    return jnp.einsum("bnm,bmd->bnd", alpha, x)


if __name__ == "__main__":
    # Shapes from the original module: batch=10, n=15, dim=40, hidden_dim=20.
    batch, n, dim, hidden_dim = 10, 15, 40, 20

    key = jax.random.PRNGKey(0)
    kx, kw, kb = jax.random.split(key, 3)

    x = jax.random.normal(kx, (batch, n, dim), dtype=jnp.float32)
    # Deterministic Linear params (stored as (dim, hidden) == W^T for y = xW^T + b).
    bound = 1.0 / jnp.sqrt(jnp.float32(dim))
    w = jax.random.uniform(kw, (dim, hidden_dim), minval=-bound, maxval=bound,
                           dtype=jnp.float32)
    b = jax.random.uniform(kb, (hidden_dim,), minval=-bound, maxval=bound,
                           dtype=jnp.float32)

    out = jax.block_until_ready(self_attention(x, w, b))
    ref = _reference(x, w, b)

    assert out.shape == (batch, n, dim)
    # Tolerance slightly relaxed because the softmax denominator uses the EUP
    # approximate reciprocal (pl.reciprocal(approx=True)).
    assert jnp.allclose(out, ref, atol=5e-3, rtol=5e-3), "mismatch vs reference"

    print("KERNEL_OK")
</pallas_src>

<mosaic_0001>
module attributes {stable_mosaic.version = 11 : i64} {
  func.func @_self_attention_kernel(%arg0: memref<10x15x128xf32, #tpu.memory_space<vmem>>, %arg1: memref<128x128xf32, #tpu.memory_space<vmem>>, %arg2: memref<1x128xf32, #tpu.memory_space<vmem>>, %arg3: memref<10x15x128xf32, #tpu.memory_space<vmem>>) attributes {dimension_semantics = [], scalar_prefetch = 0 : i64, scratch_operands = 0 : i64, tpu.core_type = #tpu.core_type<tc>} {
    %c0 = arith.constant 0 : index
    %c0_0 = arith.constant 0 : index
    %0 = vector.load %arg1[%c0, %c0_0] : memref<128x128xf32, #tpu.memory_space<vmem>>, vector<128x128xf32>
    %c0_1 = arith.constant 0 : index
    %c0_2 = arith.constant 0 : index
    %1 = vector.load %arg2[%c0_1, %c0_2] : memref<1x128xf32, #tpu.memory_space<vmem>>, vector<1x128xf32>
    %c0_3 = arith.constant 0 : index
    %c0_4 = arith.constant 0 : index
    %c0_5 = arith.constant 0 : index
    %2 = vector.load %arg0[%c0_3, %c0_4, %c0_5] : memref<10x15x128xf32, #tpu.memory_space<vmem>>, vector<1x15x128xf32>
    %3 = vector.shape_cast %2 : vector<1x15x128xf32> to vector<15x128xf32>
    %cst = arith.constant dense<0.000000e+00> : vector<15x128xf32>
    %4 = tpu.matmul %3, %0, %cst {dimension_numbers = #tpu.dot_dimension_numbers<[1], [0], [0], [1], [0, 0, 1, 1], [], []>} : vector<15x128xf32>, vector<128x128xf32>, vector<15x128xf32> -> vector<15x128xf32>
    %5 = vector.broadcast %1 : vector<1x128xf32> to vector<15x128xf32>
    %6 = arith.addf %4, %5 : vector<15x128xf32>
    %cst_6 = arith.constant dense<0.000000e+00> : vector<15x15xf32>
    %7 = tpu.matmul %6, %6, %cst_6 {dimension_numbers = #tpu.dot_dimension_numbers<[1], [1], [0], [0], [0, 0, 1, 0], [], []>} : vector<15x128xf32>, vector<15x128xf32>, vector<15x15xf32> -> vector<15x15xf32>
    %cst_7 = arith.constant dense<0xFF800000> : vector<15xf32>
    %8 = vector.multi_reduction <maximumf>, %7, %cst_7 [1] : vector<15x15xf32> to vector<15xf32>
    %9 = vector.shape_cast %8 : vector<15xf32> to vector<15x1xf32>
    %10 = vector.broadcast %9 : vector<15x1xf32> to vector<15x15xf32>
    %11 = arith.subf %7, %10 : vector<15x15xf32>
    %12 = math.exp %11 : vector<15x15xf32>
    %cst_8 = arith.constant dense<0.000000e+00> : vector<15xf32>
    %13 = vector.multi_reduction <add>, %12, %cst_8 [1] : vector<15x15xf32> to vector<15xf32>
    %14 = vector.shape_cast %13 : vector<15xf32> to vector<15x1xf32>
    %15 = tpu.reciprocal %14 {approx = true} : vector<15x1xf32> -> vector<15x1xf32>
    %16 = vector.broadcast %15 : vector<15x1xf32> to vector<15x15xf32>
    %17 = arith.mulf %12, %16 : vector<15x15xf32>
    %cst_9 = arith.constant dense<0.000000e+00> : vector<15x128xf32>
    %18 = tpu.matmul %17, %3, %cst_9 {dimension_numbers = #tpu.dot_dimension_numbers<[1], [0], [0], [1], [0, 0, 1, 1], [], []>} : vector<15x15xf32>, vector<15x128xf32>, vector<15x128xf32> -> vector<15x128xf32>
    %c0_10 = arith.constant 0 : index
    %c0_11 = arith.constant 0 : index
    %c0_12 = arith.constant 0 : index
    %19 = vector.load %arg3[%c0_10, %c0_11, %c0_12] : memref<10x15x128xf32, #tpu.memory_space<vmem>>, vector<1x15x128xf32>
    %20 = vector.shape_cast %19 : vector<1x15x128xf32> to vector<15x128xf32>
    %21 = vector.shape_cast %18 : vector<15x128xf32> to vector<1x15x128xf32>
    tpu.vector_store %arg3[%c0_10, %c0_11, %c0_12], %21 {strides = array<i32>} : memref<10x15x128xf32, #tpu.memory_space<vmem>>, vector<1x15x128xf32>,
    %c1 = arith.constant 1 : index
    %c0_13 = arith.constant 0 : index
    %c0_14 = arith.constant 0 : index
    %22 = vector.load %arg0[%c1, %c0_13, %c0_14] : memref<10x15x128xf32, #tpu.memory_space<vmem>>, vector<1x15x128xf32>
    %23 = vector.shape_cast %22 : vector<1x15x128xf32> to vector<15x128xf32>
    %cst_15 = arith.constant dense<0.000000e+00> : vector<15x128xf32>
    %24 = tpu.matmul %23, %0, %cst_15 {dimension_numbers = #tpu.dot_dimension_numbers<[1], [0], [0], [1], [0, 0, 1, 1], [], []>} : vector<15x128xf32>, vector<128x128xf32>, vector<15x128xf32> -> vector<15x128xf32>
    %25 = vector.broadcast %1 : vector<1x128xf32> to vector<15x128xf32>
    %26 = arith.addf %24, %25 : vector<15x128xf32>
    %cst_16 = arith.constant dense<0.000000e+00> : vector<15x15xf32>
    %27 = tpu.matmul %26, %26, %cst_16 {dimension_numbers = #tpu.dot_dimension_numbers<[1], [1], [0], [0], [0, 0, 1, 0], [], []>} : vector<15x128xf32>, vector<15x128xf32>, vector<15x15xf32> -> vector<15x15xf32>
    %cst_17 = arith.constant dense<0xFF800000> : vector<15xf32>
    %28 = vector.multi_reduction <maximumf>, %27, %cst_17 [1] : vector<15x15xf32> to vector<15xf32>
    %29 = vector.shape_cast %28 : vector<15xf32> to vector<15x1xf32>
    %30 = vector.broadcast %29 : vector<15x1xf32> to vector<15x15xf32>
    %31 = arith.subf %27, %30 : vector<15x15xf32>
    %32 = math.exp %31 : vector<15x15xf32>
    %cst_18 = arith.constant dense<0.000000e+00> : vector<15xf32>
    %33 = vector.multi_reduction <add>, %32, %cst_18 [1] : vector<15x15xf32> to vector<15xf32>
    %34 = vector.shape_cast %33 : vector<15xf32> to vector<15x1xf32>
    %35 = tpu.reciprocal %34 {approx = true} : vector<15x1xf32> -> vector<15x1xf32>
    %36 = vector.broadcast %35 : vector<15x1xf32> to vector<15x15xf32>
    %37 = arith.mulf %32, %36 : vector<15x15xf32>
    %cst_19 = arith.constant dense<0.000000e+00> : vector<15x128xf32>
    %38 = tpu.matmul %37, %23, %cst_19 {dimension_numbers = #tpu.dot_dimension_numbers<[1], [0], [0], [1], [0, 0, 1, 1], [], []>} : vector<15x15xf32>, vector<15x128xf32>, vector<15x128xf32> -> vector<15x128xf32>
    %c1_20 = arith.constant 1 : index
    %c0_21 = arith.constant 0 : index
    %c0_22 = arith.constant 0 : index
    %39 = vector.load %arg3[%c1_20, %c0_21, %c0_22] : memref<10x15x128xf32, #tpu.memory_space<vmem>>, vector<1x15x128xf32>
    %40 = vector.shape_cast %39 : vector<1x15x128xf32> to vector<15x128xf32>
    %41 = vector.shape_cast %38 : vector<15x128xf32> to vector<1x15x128xf32>
    tpu.vector_store %arg3[%c1_20, %c0_21, %c0_22], %41 {strides = array<i32>} : memref<10x15x128xf32, #tpu.memory_space<vmem>>, vector<1x15x128xf32>,
    %c2 = arith.constant 2 : index
    %c0_23 = arith.constant 0 : index
    %c0_24 = arith.constant 0 : index
    %42 = vector.load %arg0[%c2, %c0_23, %c0_24] : memref<10x15x128xf32, #tpu.memory_space<vmem>>, vector<1x15x128xf32>
    %43 = vector.shape_cast %42 : vector<1x15x128xf32> to vector<15x128xf32>
    %cst_25 = arith.constant dense<0.000000e+00> : vector<15x128xf32>
    %44 = tpu.matmul %43, %0, %cst_25 {dimension_numbers = #tpu.dot_dimension_numbers<[1], [0], [0], [1], [0, 0, 1, 1], [], []>} : vector<15x128xf32>, vector<128x128xf32>, vector<15x128xf32> -> vector<15x128xf32>
    %45 = vector.broadcast %1 : vector<1x128xf32> to vector<15x128xf32>
    %46 = arith.addf %44, %45 : vector<15x128xf32>
    %cst_26 = arith.constant dense<0.000000e+00> : vector<15x15xf32>
    %47 = tpu.matmul %46, %46, %cst_26 {dimension_numbers = #tpu.dot_dimension_numbers<[1], [1], [0], [0], [0, 0, 1, 0], [], []>} : vector<15x128xf32>, vector<15x128xf32>, vector<15x15xf32> -> vector<15x15xf32>
    %cst_27 = arith.constant dense<0xFF800000> : vector<15xf32>
    %48 = vector.multi_reduction <maximumf>, %47, %cst_27 [1] : vector<15x15xf32> to vector<15xf32>
    %49 = vector.shape_cast %48 : vector<15xf32> to vector<15x1xf32>
    %50 = vector.broadcast %49 : vector<15x1xf32> to vector<15x15xf32>
    %51 = arith.subf %47, %50 : vector<15x15xf32>
    %52 = math.exp %51 : vector<15x15xf32>
    %cst_28 = arith.constant dense<0.000000e+00> : vector<15xf32>
    %53 = vector.multi_reduction <add>, %52, %cst_28 [1] : vector<15x15xf32> to vector<15xf32>
    %54 = vector.shape_cast %53 : vector<15xf32> to vector<15x1xf32>
    %55 = tpu.reciprocal %54 {approx = true} : vector<15x1xf32> -> vector<15x1xf32>
    %56 = vector.broadcast %55 : vector<15x1xf32> to vector<15x15xf32>
    %57 = arith.mulf %52, %56 : vector<15x15xf32>
    %cst_29 = arith.constant dense<0.000000e+00> : vector<15x128xf32>
    %58 = tpu.matmul %57, %43, %cst_29 {dimension_numbers = #tpu.dot_dimension_numbers<[1], [0], [0], [1], [0, 0, 1, 1], [], []>} : vector<15x15xf32>, vector<15x128xf32>, vector<15x128xf32> -> vector<15x128xf32>
    %c2_30 = arith.constant 2 : index
    %c0_31 = arith.constant 0 : index
    %c0_32 = arith.constant 0 : index
    %59 = vector.load %arg3[%c2_30, %c0_31, %c0_32] : memref<10x15x128xf32, #tpu.memory_space<vmem>>, vector<1x15x128xf32>
    %60 = vector.shape_cast %59 : vector<1x15x128xf32> to vector<15x128xf32>
    %61 = vector.shape_cast %58 : vector<15x128xf32> to vector<1x15x128xf32>
    tpu.vector_store %arg3[%c2_30, %c0_31, %c0_32], %61 {strides = array<i32>} : memref<10x15x128xf32, #tpu.memory_space<vmem>>, vector<1x15x128xf32>,
    %c3 = arith.constant 3 : index
    %c0_33 = arith.constant 0 : index
    %c0_34 = arith.constant 0 : index
    %62 = vector.load %arg0[%c3, %c0_33, %c0_34] : memref<10x15x128xf32, #tpu.memory_space<vmem>>, vector<1x15x128xf32>
    %63 = vector.shape_cast %62 : vector<1x15x128xf32> to vector<15x128xf32>
    %cst_35 = arith.constant dense<0.000000e+00> : vector<15x128xf32>
    %64 = tpu.matmul %63, %0, %cst_35 {dimension_numbers = #tpu.dot_dimension_numbers<[1], [0], [0], [1], [0, 0, 1, 1], [], []>} : vector<15x128xf32>, vector<128x128xf32>, vector<15x128xf32> -> vector<15x128xf32>
    %65 = vector.broadcast %1 : vector<1x128xf32> to vector<15x128xf32>
    %66 = arith.addf %64, %65 : vector<15x128xf32>
    %cst_36 = arith.constant dense<0.000000e+00> : vector<15x15xf32>
    %67 = tpu.matmul %66, %66, %cst_36 {dimension_numbers = #tpu.dot_dimension_numbers<[1], [1], [0], [0], [0, 0, 1, 0], [], []>} : vector<15x128xf32>, vector<15x128xf32>, vector<15x15xf32> -> vector<15x15xf32>
    %cst_37 = arith.constant dense<0xFF800000> : vector<15xf32>
    %68 = vector.multi_reduction <maximumf>, %67, %cst_37 [1] : vector<15x15xf32> to vector<15xf32>
    %69 = vector.shape_cast %68 : vector<15xf32> to vector<15x1xf32>
    %70 = vector.broadcast %69 : vector<15x1xf32> to vector<15x15xf32>
    %71 = arith.subf %67, %70 : vector<15x15xf32>
    %72 = math.exp %71 : vector<15x15xf32>
    %cst_38 = arith.constant dense<0.000000e+00> : vector<15xf32>
    %73 = vector.multi_reduction <add>, %72, %cst_38 [1] : vector<15x15xf32> to vector<15xf32>
    %74 = vector.shape_cast %73 : vector<15xf32> to vector<15x1xf32>
    %75 = tpu.reciprocal %74 {approx = true} : vector<15x1xf32> -> vector<15x1xf32>
    %76 = vector.broadcast %75 : vector<15x1xf32> to vector<15x15xf32>
    %77 = arith.mulf %72, %76 : vector<15x15xf32>
    %cst_39 = arith.constant dense<0.000000e+00> : vector<15x128xf32>
    %78 = tpu.matmul %77, %63, %cst_39 {dimension_numbers = #tpu.dot_dimension_numbers<[1], [0], [0], [1], [0, 0, 1, 1], [], []>} : vector<15x15xf32>, vector<15x128xf32>, vector<15x128xf32> -> vector<15x128xf32>
    %c3_40 = arith.constant 3 : index
    %c0_41 = arith.constant 0 : index
    %c0_42 = arith.constant 0 : index
    %79 = vector.load %arg3[%c3_40, %c0_41, %c0_42] : memref<10x15x128xf32, #tpu.memory_space<vmem>>, vector<1x15x128xf32>
    %80 = vector.shape_cast %79 : vector<1x15x128xf32> to vector<15x128xf32>
    %81 = vector.shape_cast %78 : vector<15x128xf32> to vector<1x15x128xf32>
    tpu.vector_store %arg3[%c3_40, %c0_41, %c0_42], %81 {strides = array<i32>} : memref<10x15x128xf32, #tpu.memory_space<vmem>>, vector<1x15x128xf32>,
    %c4 = arith.constant 4 : index
    %c0_43 = arith.constant 0 : index
    %c0_44 = arith.constant 0 : index
    %82 = vector.load %arg0[%c4, %c0_43, %c0_44] : memref<10x15x128xf32, #tpu.memory_space<vmem>>, vector<1x15x128xf32>
    %83 = vector.shape_cast %82 : vector<1x15x128xf32> to vector<15x128xf32>
    %cst_45 = arith.constant dense<0.000000e+00> : vector<15x128xf32>
    %84 = tpu.matmul %83, %0, %cst_45 {dimension_numbers = #tpu.dot_dimension_numbers<[1], [0], [0], [1], [0, 0, 1, 1], [], []>} : vector<15x128xf32>, vector<128x128xf32>, vector<15x128xf32> -> vector<15x128xf32>
    %85 = vector.broadcast %1 : vector<1x128xf32> to vector<15x128xf32>
    %86 = arith.addf %84, %85 : vector<15x128xf32>
    %cst_46 = arith.constant dense<0.000000e+00> : vector<15x15xf32>
    %87 = tpu.matmul %86, %86, %cst_46 {dimension_numbers = #tpu.dot_dimension_numbers<[1], [1], [0], [0], [0, 0, 1, 0], [], []>} : vector<15x128xf32>, vector<15x128xf32>, vector<15x15xf32> -> vector<15x15xf32>
    %cst_47 = arith.constant dense<0xFF800000> : vector<15xf32>
    %88 = vector.multi_reduction <maximumf>, %87, %cst_47 [1] : vector<15x15xf32> to vector<15xf32>
    %89 = vector.shape_cast %88 : vector<15xf32> to vector<15x1xf32>
    %90 = vector.broadcast %89 : vector<15x1xf32> to vector<15x15xf32>
    %91 = arith.subf %87, %90 : vector<15x15xf32>
    %92 = math.exp %91 : vector<15x15xf32>
    %cst_48 = arith.constant dense<0.000000e+00> : vector<15xf32>
    %93 = vector.multi_reduction <add>, %92, %cst_48 [1] : vector<15x15xf32> to vector<15xf32>
    %94 = vector.shape_cast %93 : vector<15xf32> to vector<15x1xf32>
    %95 = tpu.reciprocal %94 {approx = true} : vector<15x1xf32> -> vector<15x1xf32>
    %96 = vector.broadcast %95 : vector<15x1xf32> to vector<15x15xf32>
    %97 = arith.mulf %92, %96 : vector<15x15xf32>
    %cst_49 = arith.constant dense<0.000000e+00> : vector<15x128xf32>
    %98 = tpu.matmul %97, %83, %cst_49 {dimension_numbers = #tpu.dot_dimension_numbers<[1], [0], [0], [1], [0, 0, 1, 1], [], []>} : vector<15x15xf32>, vector<15x128xf32>, vector<15x128xf32> -> vector<15x128xf32>
    %c4_50 = arith.constant 4 : index
    %c0_51 = arith.constant 0 : index
    %c0_52 = arith.constant 0 : index
    %99 = vector.load %arg3[%c4_50, %c0_51, %c0_52] : memref<10x15x128xf32, #tpu.memory_space<vmem>>, vector<1x15x128xf32>
    %100 = vector.shape_cast %99 : vector<1x15x128xf32> to vector<15x128xf32>
    %101 = vector.shape_cast %98 : vector<15x128xf32> to vector<1x15x128xf32>
    tpu.vector_store %arg3[%c4_50, %c0_51, %c0_52], %101 {strides = array<i32>} : memref<10x15x128xf32, #tpu.memory_space<vmem>>, vector<1x15x128xf32>,
    %c5 = arith.constant 5 : index
    %c0_53 = arith.constant 0 : index
    %c0_54 = arith.constant 0 : index
    %102 = vector.load %arg0[%c5, %c0_53, %c0_54] : memref<10x15x128xf32, #tpu.memory_space<vmem>>, vector<1x15x128xf32>
    %103 = vector.shape_cast %102 : vector<1x15x128xf32> to vector<15x128xf32>
    %cst_55 = arith.constant dense<0.000000e+00> : vector<15x128xf32>
    %104 = tpu.matmul %103, %0, %cst_55 {dimension_numbers = #tpu.dot_dimension_numbers<[1], [0], [0], [1], [0, 0, 1, 1], [], []>} : vector<15x128xf32>, vector<128x128xf32>, vector<15x128xf32> -> vector<15x128xf32>
    %105 = vector.broadcast %1 : vector<1x128xf32> to vector<15x128xf32>
    %106 = arith.addf %104, %105 : vector<15x128xf32>
    %cst_56 = arith.constant dense<0.000000e+00> : vector<15x15xf32>
    %107 = tpu.matmul %106, %106, %cst_56 {dimension_numbers = #tpu.dot_dimension_numbers<[1], [1], [0], [0], [0, 0, 1, 0], [], []>} : vector<15x128xf32>, vector<15x128xf32>, vector<15x15xf32> -> vector<15x15xf32>
    %cst_57 = arith.constant dense<0xFF800000> : vector<15xf32>
    %108 = vector.multi_reduction <maximumf>, %107, %cst_57 [1] : vector<15x15xf32> to vector<15xf32>
    %109 = vector.shape_cast %108 : vector<15xf32> to vector<15x1xf32>
    %110 = vector.broadcast %109 : vector<15x1xf32> to vector<15x15xf32>
    %111 = arith.subf %107, %110 : vector<15x15xf32>
    %112 = math.exp %111 : vector<15x15xf32>
    %cst_58 = arith.constant dense<0.000000e+00> : vector<15xf32>
    %113 = vector.multi_reduction <add>, %112, %cst_58 [1] : vector<15x15xf32> to vector<15xf32>
    %114 = vector.shape_cast %113 : vector<15xf32> to vector<15x1xf32>
    %115 = tpu.reciprocal %114 {approx = true} : vector<15x1xf32> -> vector<15x1xf32>
    %116 = vector.broadcast %115 : vector<15x1xf32> to vector<15x15xf32>
    %117 = arith.mulf %112, %116 : vector<15x15xf32>
    %cst_59 = arith.constant dense<0.000000e+00> : vector<15x128xf32>
    %118 = tpu.matmul %117, %103, %cst_59 {dimension_numbers = #tpu.dot_dimension_numbers<[1], [0], [0], [1], [0, 0, 1, 1], [], []>} : vector<15x15xf32>, vector<15x128xf32>, vector<15x128xf32> -> vector<15x128xf32>
    %c5_60 = arith.constant 5 : index
    %c0_61 = arith.constant 0 : index
    %c0_62 = arith.constant 0 : index
    %119 = vector.load %arg3[%c5_60, %c0_61, %c0_62] : memref<10x15x128xf32, #tpu.memory_space<vmem>>, vector<1x15x128xf32>
    %120 = vector.shape_cast %119 : vector<1x15x128xf32> to vector<15x128xf32>
    %121 = vector.shape_cast %118 : vector<15x128xf32> to vector<1x15x128xf32>
    tpu.vector_store %arg3[%c5_60, %c0_61, %c0_62], %121 {strides = array<i32>} : memref<10x15x128xf32, #tpu.memory_space<vmem>>, vector<1x15x128xf32>,
    %c6 = arith.constant 6 : index
    %c0_63 = arith.constant 0 : index
    %c0_64 = arith.constant 0 : index
    %122 = vector.load %arg0[%c6, %c0_63, %c0_64] : memref<10x15x128xf32, #tpu.memory_space<vmem>>, vector<1x15x128xf32>
    %123 = vector.shape_cast %122 : vector<1x15x128xf32> to vector<15x128xf32>
    %cst_65 = arith.constant dense<0.000000e+00> : vector<15x128xf32>
    %124 = tpu.matmul %123, %0, %cst_65 {dimension_numbers = #tpu.dot_dimension_numbers<[1], [0], [0], [1], [0, 0, 1, 1], [], []>} : vector<15x128xf32>, vector<128x128xf32>, vector<15x128xf32> -> vector<15x128xf32>
    %125 = vector.broadcast %1 : vector<1x128xf32> to vector<15x128xf32>
    %126 = arith.addf %124, %125 : vector<15x128xf32>
    %cst_66 = arith.constant dense<0.000000e+00> : vector<15x15xf32>
    %127 = tpu.matmul %126, %126, %cst_66 {dimension_numbers = #tpu.dot_dimension_numbers<[1], [1], [0], [0], [0, 0, 1, 0], [], []>} : vector<15x128xf32>, vector<15x128xf32>, vector<15x15xf32> -> vector<15x15xf32>
    %cst_67 = arith.constant dense<0xFF800000> : vector<15xf32>
    %128 = vector.multi_reduction <maximumf>, %127, %cst_67 [1] : vector<15x15xf32> to vector<15xf32>
    %129 = vector.shape_cast %128 : vector<15xf32> to vector<15x1xf32>
    %130 = vector.broadcast %129 : vector<15x1xf32> to vector<15x15xf32>
    %131 = arith.subf %127, %130 : vector<15x15xf32>
    %132 = math.exp %131 : vector<15x15xf32>
    %cst_68 = arith.constant dense<0.000000e+00> : vector<15xf32>
    %133 = vector.multi_reduction <add>, %132, %cst_68 [1] : vector<15x15xf32> to vector<15xf32>
    %134 = vector.shape_cast %133 : vector<15xf32> to vector<15x1xf32>
    %135 = tpu.reciprocal %134 {approx = true} : vector<15x1xf32> -> vector<15x1xf32>
    %136 = vector.broadcast %135 : vector<15x1xf32> to vector<15x15xf32>
    %137 = arith.mulf %132, %136 : vector<15x15xf32>
    %cst_69 = arith.constant dense<0.000000e+00> : vector<15x128xf32>
    %138 = tpu.matmul %137, %123, %cst_69 {dimension_numbers = #tpu.dot_dimension_numbers<[1], [0], [0], [1], [0, 0, 1, 1], [], []>} : vector<15x15xf32>, vector<15x128xf32>, vector<15x128xf32> -> vector<15x128xf32>
    %c6_70 = arith.constant 6 : index
    %c0_71 = arith.constant 0 : index
    %c0_72 = arith.constant 0 : index
    %139 = vector.load %arg3[%c6_70, %c0_71, %c0_72] : memref<10x15x128xf32, #tpu.memory_space<vmem>>, vector<1x15x128xf32>
    %140 = vector.shape_cast %139 : vector<1x15x128xf32> to vector<15x128xf32>
    %141 = vector.shape_cast %138 : vector<15x128xf32> to vector<1x15x128xf32>
    tpu.vector_store %arg3[%c6_70, %c0_71, %c0_72], %141 {strides = array<i32>} : memref<10x15x128xf32, #tpu.memory_space<vmem>>, vector<1x15x128xf32>,
    %c7 = arith.constant 7 : index
    %c0_73 = arith.constant 0 : index
    %c0_74 = arith.constant 0 : index
    %142 = vector.load %arg0[%c7, %c0_73, %c0_74] : memref<10x15x128xf32, #tpu.memory_space<vmem>>, vector<1x15x128xf32>
    %143 = vector.shape_cast %142 : vector<1x15x128xf32> to vector<15x128xf32>
    %cst_75 = arith.constant dense<0.000000e+00> : vector<15x128xf32>
    %144 = tpu.matmul %143, %0, %cst_75 {dimension_numbers = #tpu.dot_dimension_numbers<[1], [0], [0], [1], [0, 0, 1, 1], [], []>} : vector<15x128xf32>, vector<128x128xf32>, vector<15x128xf32> -> vector<15x128xf32>
    %145 = vector.broadcast %1 : vector<1x128xf32> to vector<15x128xf32>
    %146 = arith.addf %144, %145 : vector<15x128xf32>
    %cst_76 = arith.constant dense<0.000000e+00> : vector<15x15xf32>
    %147 = tpu.matmul %146, %146, %cst_76 {dimension_numbers = #tpu.dot_dimension_numbers<[1], [1], [0], [0], [0, 0, 1, 0], [], []>} : vector<15x128xf32>, vector<15x128xf32>, vector<15x15xf32> -> vector<15x15xf32>
    %cst_77 = arith.constant dense<0xFF800000> : vector<15xf32>
    %148 = vector.multi_reduction <maximumf>, %147, %cst_77 [1] : vector<15x15xf32> to vector<15xf32>
    %149 = vector.shape_cast %148 : vector<15xf32> to vector<15x1xf32>
    %150 = vector.broadcast %149 : vector<15x1xf32> to vector<15x15xf32>
    %151 = arith.subf %147, %150 : vector<15x15xf32>
    %152 = math.exp %151 : vector<15x15xf32>
    %cst_78 = arith.constant dense<0.000000e+00> : vector<15xf32>
    %153 = vector.multi_reduction <add>, %152, %cst_78 [1] : vector<15x15xf32> to vector<15xf32>
    %154 = vector.shape_cast %153 : vector<15xf32> to vector<15x1xf32>
    %155 = tpu.reciprocal %154 {approx = true} : vector<15x1xf32> -> vector<15x1xf32>
    %156 = vector.broadcast %155 : vector<15x1xf32> to vector<15x15xf32>
    %157 = arith.mulf %152, %156 : vector<15x15xf32>
    %cst_79 = arith.constant dense<0.000000e+00> : vector<15x128xf32>
    %158 = tpu.matmul %157, %143, %cst_79 {dimension_numbers = #tpu.dot_dimension_numbers<[1], [0], [0], [1], [0, 0, 1, 1], [], []>} : vector<15x15xf32>, vector<15x128xf32>, vector<15x128xf32> -> vector<15x128xf32>
    %c7_80 = arith.constant 7 : index
    %c0_81 = arith.constant 0 : index
    %c0_82 = arith.constant 0 : index
    %159 = vector.load %arg3[%c7_80, %c0_81, %c0_82] : memref<10x15x128xf32, #tpu.memory_space<vmem>>, vector<1x15x128xf32>
    %160 = vector.shape_cast %159 : vector<1x15x128xf32> to vector<15x128xf32>
    %161 = vector.shape_cast %158 : vector<15x128xf32> to vector<1x15x128xf32>
    tpu.vector_store %arg3[%c7_80, %c0_81, %c0_82], %161 {strides = array<i32>} : memref<10x15x128xf32, #tpu.memory_space<vmem>>, vector<1x15x128xf32>,
    %c8 = arith.constant 8 : index
    %c0_83 = arith.constant 0 : index
    %c0_84 = arith.constant 0 : index
    %162 = vector.load %arg0[%c8, %c0_83, %c0_84] : memref<10x15x128xf32, #tpu.memory_space<vmem>>, vector<1x15x128xf32>
    %163 = vector.shape_cast %162 : vector<1x15x128xf32> to vector<15x128xf32>
    %cst_85 = arith.constant dense<0.000000e+00> : vector<15x128xf32>
    %164 = tpu.matmul %163, %0, %cst_85 {dimension_numbers = #tpu.dot_dimension_numbers<[1], [0], [0], [1], [0, 0, 1, 1], [], []>} : vector<15x128xf32>, vector<128x128xf32>, vector<15x128xf32> -> vector<15x128xf32>
    %165 = vector.broadcast %1 : vector<1x128xf32> to vector<15x128xf32>
    %166 = arith.addf %164, %165 : vector<15x128xf32>
    %cst_86 = arith.constant dense<0.000000e+00> : vector<15x15xf32>
    %167 = tpu.matmul %166, %166, %cst_86 {dimension_numbers = #tpu.dot_dimension_numbers<[1], [1], [0], [0], [0, 0, 1, 0], [], []>} : vector<15x128xf32>, vector<15x128xf32>, vector<15x15xf32> -> vector<15x15xf32>
    %cst_87 = arith.constant dense<0xFF800000> : vector<15xf32>
    %168 = vector.multi_reduction <maximumf>, %167, %cst_87 [1] : vector<15x15xf32> to vector<15xf32>
    %169 = vector.shape_cast %168 : vector<15xf32> to vector<15x1xf32>
    %170 = vector.broadcast %169 : vector<15x1xf32> to vector<15x15xf32>
    %171 = arith.subf %167, %170 : vector<15x15xf32>
    %172 = math.exp %171 : vector<15x15xf32>
    %cst_88 = arith.constant dense<0.000000e+00> : vector<15xf32>
    %173 = vector.multi_reduction <add>, %172, %cst_88 [1] : vector<15x15xf32> to vector<15xf32>
    %174 = vector.shape_cast %173 : vector<15xf32> to vector<15x1xf32>
    %175 = tpu.reciprocal %174 {approx = true} : vector<15x1xf32> -> vector<15x1xf32>
    %176 = vector.broadcast %175 : vector<15x1xf32> to vector<15x15xf32>
    %177 = arith.mulf %172, %176 : vector<15x15xf32>
    %cst_89 = arith.constant dense<0.000000e+00> : vector<15x128xf32>
    %178 = tpu.matmul %177, %163, %cst_89 {dimension_numbers = #tpu.dot_dimension_numbers<[1], [0], [0], [1], [0, 0, 1, 1], [], []>} : vector<15x15xf32>, vector<15x128xf32>, vector<15x128xf32> -> vector<15x128xf32>
    %c8_90 = arith.constant 8 : index
    %c0_91 = arith.constant 0 : index
    %c0_92 = arith.constant 0 : index
    %179 = vector.load %arg3[%c8_90, %c0_91, %c0_92] : memref<10x15x128xf32, #tpu.memory_space<vmem>>, vector<1x15x128xf32>
    %180 = vector.shape_cast %179 : vector<1x15x128xf32> to vector<15x128xf32>
    %181 = vector.shape_cast %178 : vector<15x128xf32> to vector<1x15x128xf32>
    tpu.vector_store %arg3[%c8_90, %c0_91, %c0_92], %181 {strides = array<i32>} : memref<10x15x128xf32, #tpu.memory_space<vmem>>, vector<1x15x128xf32>,
    %c9 = arith.constant 9 : index
    %c0_93 = arith.constant 0 : index
    %c0_94 = arith.constant 0 : index
    %182 = vector.load %arg0[%c9, %c0_93, %c0_94] : memref<10x15x128xf32, #tpu.memory_space<vmem>>, vector<1x15x128xf32>
    %183 = vector.shape_cast %182 : vector<1x15x128xf32> to vector<15x128xf32>
    %cst_95 = arith.constant dense<0.000000e+00> : vector<15x128xf32>
    %184 = tpu.matmul %183, %0, %cst_95 {dimension_numbers = #tpu.dot_dimension_numbers<[1], [0], [0], [1], [0, 0, 1, 1], [], []>} : vector<15x128xf32>, vector<128x128xf32>, vector<15x128xf32> -> vector<15x128xf32>
    %185 = vector.broadcast %1 : vector<1x128xf32> to vector<15x128xf32>
    %186 = arith.addf %184, %185 : vector<15x128xf32>
    %cst_96 = arith.constant dense<0.000000e+00> : vector<15x15xf32>
    %187 = tpu.matmul %186, %186, %cst_96 {dimension_numbers = #tpu.dot_dimension_numbers<[1], [1], [0], [0], [0, 0, 1, 0], [], []>} : vector<15x128xf32>, vector<15x128xf32>, vector<15x15xf32> -> vector<15x15xf32>
    %cst_97 = arith.constant dense<0xFF800000> : vector<15xf32>
    %188 = vector.multi_reduction <maximumf>, %187, %cst_97 [1] : vector<15x15xf32> to vector<15xf32>
    %189 = vector.shape_cast %188 : vector<15xf32> to vector<15x1xf32>
    %190 = vector.broadcast %189 : vector<15x1xf32> to vector<15x15xf32>
    %191 = arith.subf %187, %190 : vector<15x15xf32>
    %192 = math.exp %191 : vector<15x15xf32>
    %cst_98 = arith.constant dense<0.000000e+00> : vector<15xf32>
    %193 = vector.multi_reduction <add>, %192, %cst_98 [1] : vector<15x15xf32> to vector<15xf32>
    %194 = vector.shape_cast %193 : vector<15xf32> to vector<15x1xf32>
    %195 = tpu.reciprocal %194 {approx = true} : vector<15x1xf32> -> vector<15x1xf32>
    %196 = vector.broadcast %195 : vector<15x1xf32> to vector<15x15xf32>
    %197 = arith.mulf %192, %196 : vector<15x15xf32>
    %cst_99 = arith.constant dense<0.000000e+00> : vector<15x128xf32>
    %198 = tpu.matmul %197, %183, %cst_99 {dimension_numbers = #tpu.dot_dimension_numbers<[1], [0], [0], [1], [0, 0, 1, 1], [], []>} : vector<15x15xf32>, vector<15x128xf32>, vector<15x128xf32> -> vector<15x128xf32>
    %c9_100 = arith.constant 9 : index
    %c0_101 = arith.constant 0 : index
    %c0_102 = arith.constant 0 : index
    %199 = vector.load %arg3[%c9_100, %c0_101, %c0_102] : memref<10x15x128xf32, #tpu.memory_space<vmem>>, vector<1x15x128xf32>
    %200 = vector.shape_cast %199 : vector<1x15x128xf32> to vector<15x128xf32>
    %201 = vector.shape_cast %198 : vector<15x128xf32> to vector<1x15x128xf32>
    tpu.vector_store %arg3[%c9_100, %c0_101, %c0_102], %201 {strides = array<i32>} : memref<10x15x128xf32, #tpu.memory_space<vmem>>, vector<1x15x128xf32>,
    return
  }
}

</mosaic_0001>

<bundles_post_ra>
// kernel: tpu_custom_call.1
= control target key start
LH: loop header
LB: loop body
LE: loop exit
PB: predicated region body
PF: predicated region fallthrough
CT: control target
= control target key end

     0   :  { %8 = vsyncpa [#allocation3], 0  ;;  %s4450_s0 = inlined_call_operand.hbm [shape: f32[10,15,128], index: 0, kind: input, shape index: {}]   ;;  %s4451_s1 = inlined_call_operand.hbm [shape: f32[128,128], index: 1, kind: input, shape index: {}]   ;;  %s4452_s2 = inlined_call_operand.vmem [shape: f32[1,128], index: 2, kind: input, shape index: {}]   ;;  %s4453_s3 = inlined_call_operand.hbm [shape: f32[10,15,128], index: 3, kind: output, shape index: {}]  }
   0x1   :  { %9 = vsyncpa [#allocation6], 0 }
   0x2   :  { %10 = vsyncpa [#allocation4], 0  ;;  %s4065_s12 = smov [#allocation2]   ;;  %s3993_s16 = scalar_lea.hbm %s4450_s0, 2560 }
   0x3   :  { %s16_s13 = sshll.u32 %s4065_s12, 4  ;;  %p3994_p0 = scmp.ne.s32.totalorder %s4450_s0, %s3993_s16  ;;  %s17_s13 = int_to_ptr.vmem [resolvable:$true] %s16_s13 }
   0x4   :  { %p3997_p1 = scmp.lt.u32.totalorder %s3993_s16, %s4450_s0 }
   0x6   :  { %p3999_p2 = pnand %p3997_p1, %p3994_p0 }
   0x8   :  { %4002 = shalt.err (!%p3999_p2)
}
   0x9   :  { %s4003_s21 = scalar_lea.vmem %s17_s13, 2560  ;;  %p4008_p4 = scmp.lt.s32.totalorder %s17_s13, %s17_s13 }
   0xa   :  { %p4004_p3 = scmp.ne.s32.totalorder %s17_s13, %s4003_s21  ;;  %p4009_p5 = scmp.lt.s32.totalorder %s4003_s21, %s4003_s21 }
   0xc   :  { %p4010_p6 = por %p4009_p5, %p4008_p4 }
   0xe   :  { %p4011_p7 = pnand %p4010_p6, %p4004_p3 }
  0x10   :  { %4014 = shalt.err (!%p4011_p7)
}
  0x11   :  { %s4066_s22 = smov 128   ;;  %s4067_s23 = smov 8  }
  0x12   :  { %22 = dma.hbm_to_vmem [thread:$0]  %s4450_s0, 2560, %s17_s13, [#allocation3], %s4066_s22, %s4066_s22, %s4067_s23  }
  0x13   :  { %s4068_s26 = smov [#allocation5]   ;;  %s4015_s30 = scalar_lea.hbm %s4451_s1, 2048 }
  0x14   :  { %s28_s27 = sshll.u32 %s4068_s26, 4  ;;  %p4016_p8 = scmp.ne.s32.totalorder %s4451_s1, %s4015_s30  ;;  %s29_s27 = int_to_ptr.vmem [resolvable:$true] %s28_s27 }
  0x15   :  { %p4019_p9 = scmp.lt.u32.totalorder %s4015_s30, %s4451_s1 }
  0x17   :  { %p4021_p10 = pnand %p4019_p9, %p4016_p8 }
  0x19   :  { %4024 = shalt.err (!%p4021_p10)
}
  0x1a   :  { %s4025_s8 = scalar_lea.vmem %s29_s27, 2048  ;;  %p4030_p12 = scmp.lt.s32.totalorder %s29_s27, %s29_s27 }
  0x1b   :  { %p4026_p11 = scmp.ne.s32.totalorder %s29_s27, %s4025_s8  ;;  %p4031_p13 = scmp.lt.s32.totalorder %s4025_s8, %s4025_s8 }
  0x1d   :  { %p4032_p0 = por %p4031_p13, %p4030_p12 }
  0x1f   :  { %p4033_p1 = pnand %p4032_p0, %p4026_p11 }
  0x21   :  { %4036 = shalt.err (!%p4033_p1)
}
  0x22   :  { %34 = dma.hbm_to_vmem [thread:$0]  %s4451_s1, 2048, %s29_s27, [#allocation6], %s4066_s22, %s4066_s22, %s4067_s23  }
  0x23   :  { %4059 = dma.done.wait [#allocation3], 2560  }
  0x24   :  { %4060 = vsyncadd [#allocation3], 4294964736 }
  0x25   :  { %4061 = dma.done.wait [#allocation6], 2048  }
  0x26   :  { %4062 = vsyncadd [#allocation6], 4294965248  ;;  %v43_v0 = vld [vmem:[#allocation5] sm:$0xff]  ;;  %v44_v1 = vld [vmem:[#allocation5 + $0x8] sm:$0xff]  ;;  %vm218_vm0 = vcmask 121856   ;;  %vm222_vm1 = vcmask 120832  }
  0x27   :  { %v45_v2 = vld [vmem:[#allocation5 + $0x10] sm:$0xff]  ;;  %v4121_v3 = vpack.c.bf16 %v44_v1, %v43_v0  ;;  %v46_v4 = vld [vmem:[#allocation5 + $0x18] sm:$0xff]  ;;  %v47_v6 = vld [vmem:[#allocation5 + $0x20] sm:$0xff]  ;;  %vm248_vm2 = vcmask 1046528   ;;  %vm4069_vm3 = vmmov 1  }
  0x28   :  { %v4123_v5 = vpack.c.bf16 %v46_v4, %v45_v2  ;;  %v48_v7 = vld [vmem:[#allocation5 + $0x28] sm:$0xff]  ;;  %v60_v9 = vld [vmem:[#allocation2] sm:$0xff]  ;;  %v49_v11 = vld [vmem:[#allocation5 + $0x30] sm:$0xff] }
  0x29   :  { %3487 = vmatprep.subr.bf16.mxu0 %v4121_v3  ;;  %v4128_v8 = vpack.c.bf16 %v48_v7, %v47_v6  ;;  %v61_v10 = vld [vmem:[#allocation2 + $0x8] sm:$0x7f]  ;;  %v50_v12 = vld [vmem:[#allocation5 + $0x38] sm:$0xff]  ;;  %3028 = vmatprep.mubr.f32.mxu0 %v60_v9  ;;  %v51_v15 = vld [vmem:[#allocation5 + $0x40] sm:$0xff] }
  0x2a   :  { %3489 = vmatpush3.bf16.msra.mxu0 %v4121_v3  ;;  %v4130_v13 = vpack.c.bf16 %v61_v10, %v60_v9  ;;  %v4134_v14 = vpack.c.bf16 %v50_v12, %v49_v11  ;;  %v52_v16 = vld [vmem:[#allocation5 + $0x48] sm:$0xff]  ;;  %v53_v18 = vld [vmem:[#allocation5 + $0x50] sm:$0xff]  ;;  %v54_v19 = vld [vmem:[#allocation5 + $0x58] sm:$0xff] }
  0x2b   :  { %3491 = vmatprep.subr.bf16.mxu0 %v4123_v5  ;;  %v4138_v17 = vpack.c.bf16 %v52_v16, %v51_v15  ;;  %v4142_v20 = vpack.c.bf16 %v54_v19, %v53_v18  ;;  %v55_v21 = vld [vmem:[#allocation5 + $0x60] sm:$0xff]  ;;  %v56_v22 = vld [vmem:[#allocation5 + $0x68] sm:$0xff]  ;;  %v57_v24 = vld [vmem:[#allocation5 + $0x70] sm:$0xff] }
  0x2c   :  { %v4146_v23 = vpack.c.bf16 %v56_v22, %v55_v21  ;;  %v58_v25 = vld [vmem:[#allocation5 + $0x78] sm:$0xff]  ;;  %v4158_v27 = vld [vmem:[%s4452_s2] ss:$0 sm:$0xff]  ;;  %vm4166_vm4 = vmpackc.low %vm248_vm2, %vm4069_vm3 }
  0x2d   :  { %v4150_v26 = vpack.c.bf16 %v58_v25, %v57_v24  ;;  %v330_v54 = vld [vmem:[#allocation2 + $0x10] sm:$0xff]  ;;  %v331_v55 = vld [vmem:[#allocation2 + $0x18] sm:$0x7f] }
  0x2e   :  { %3493 = vmatpush3.bf16.msra.mxu0 %v4123_v5  ;;  %v3564_v62 = vpack.c.bf16 %v331_v55, %v330_v54 }
  0x2f   :  { %3495 = vmatprep.subr.bf16.mxu0 %v4128_v8 }
  0x32   :  { %3497 = vmatpush3.bf16.msra.mxu0 %v4128_v8 }
  0x33   :  { %3499 = vmatprep.subr.bf16.mxu0 %v4134_v14 }
  0x36   :  { %3501 = vmatpush3.bf16.msra.mxu0 %v4134_v14 }
  0x37   :  { %3503 = vmatprep.subr.bf16.mxu0 %v4138_v17 }
  0x3a   :  { %3505 = vmatpush3.bf16.msra.mxu0 %v4138_v17 }
  0x3b   :  { %3507 = vmatprep.subr.bf16.mxu0 %v4142_v20 }
  0x3e   :  { %3509 = vmatpush3.bf16.msra.mxu0 %v4142_v20 }
  0x3f   :  { %3511 = vmatprep.subr.bf16.mxu0 %v4146_v23 }
  0x42   :  { %3513 = vmatpush3.bf16.msra.mxu0 %v4146_v23 }
  0x43   :  { %3515 = vmatprep.subr.bf16.mxu0 %v4150_v26 }
  0x46   :  { %3517 = vmatpush3.bf16.msra.mxu0 %v4150_v26 }
  0x49   :  { %3029 = vmatmul.mubr.f32.vlgmr.msra.gmra.mrb[0].mxu0 %v61_v10 }
 0x11c   :  { %v3030_v28 = vpop.f32.mrb[0].mxu0 }
 0x11d   :  { %v140_v29 = vadd.f32 %v3030_v28, %v4158_v27  ;;  %v134_v30 = vpop.f32.mrb[1].mxu0 }
 0x11e   :  { %v135_v31 = vadd.f32 %v4158_v27, %v134_v30  ;;  %v593_v30 = vld [vmem:[#allocation2 + $0x28] sm:$0x7f] }
 0x120   :  { %3035 = vmatprep.mubr.f32.mxu1 %v135_v31  ;;  %v3518_v32 = vpack.c.bf16 %v140_v29, %v135_v31 }
 0x122   :  { %3519 = vmatprep.subr.bf16.mxu1 %v3518_v32 }
 0x123   :  { %3521 = vmatpush3.bf16.xpose.msra.mxu1 %v3518_v32 }
 0x124   :  { %3524 = vmatprep.subr.msk.bf16.mxu1 %vm4166_vm4, %v4130_v13 }
 0x12a   :  { %3036 = vmatmul.mubr.f32.vlgmr.msra.gmra.mrb[0].mxu1 %v140_v29  ;;  %v592_v29 = vld [vmem:[#allocation2 + $0x20] sm:$0xff] }
 0x12b   :  { %3527 = vmatpush3.bf16.msk.msra.mxu1 %vm4166_vm4, %v4130_v13 }
 0x12c   :  { %3529 = vmatprep.subr.bf16.mxu1 %v4121_v3 }
 0x1fd   :  { %v3037_v33 = vpop.f32.mrb[0].mxu1 }
 0x1fe   :  { %v209_v34 = vpop.f32.mrb[1].mxu1  ;;  %v223_v36 = vsel %vm222_vm1, %v3037_v33, -inf }
 0x1ff   :  { %v219_v35 = vsel %vm218_vm0, %v209_v34, -inf }
 0x200   :  { %220 = vmax.xlane.f32.xlu0 %v219_v35 }
 0x204   :  { %224 = vmax.xlane.f32.xlu0 %v223_v36 }
 0x28d   :  { %v221_v37 = vpop.xlane.xlu0 %220 }
 0x28e   :  { %v226_v38 = vsub.f32 %v209_v34, %v221_v37  ;;  %v3606_v37 = vpack.c.bf16 %v593_v30, %v592_v29 }
 0x290   :  { %v228_v39 = vmul.f32 1.442695, %v226_v38 }
 0x291   :  { %v225_v40 = vpop.xlane.xlu0 %224 }
 0x292   :  { %3912 = vpow2.f32 %v228_v39  ;;  %v227_v41 = vsub.f32 %v3037_v33, %v225_v40 }
 0x294   :  { %v230_v42 = vmul.f32 1.442695, %v227_v41 }
 0x296   :  { %3914 = vpow2.f32 %v230_v42 }
 0x29c   :  { %v3913_v43 = vpop.eup %3912 }
 0x29d   :  { %v232_v44 = vsel %vm218_vm0, %v3913_v43, 0.0 }
 0x29e   :  { %233 = vadd.xlane.f32.xlu1 %v232_v44 }
 0x2a0   :  { %v3915_v45 = vpop.eup %3914 }
 0x2a1   :  { %v235_v46 = vsel %vm222_vm1, %v3915_v45, 0.0 }
 0x2a2   :  { %236 = vadd.xlane.f32.xlu1 %v235_v46 }
 0x32b   :  { %v234_v48 = vpop.xlane.xlu1 %233 }
 0x32c   :  { %3916 = vrcp.f32 %v234_v48 }
 0x32f   :  { %v237_v49 = vpop.xlane.xlu1 %236 }
 0x330   :  { %3918 = vrcp.f32 %v237_v49 }
 0x336   :  { %v3917_v50 = vpop.eup %3916 }
 0x337   :  { %v240_v51 = vmul.f32 %v3917_v50, %v3913_v43 }
 0x339   :  { %3042 = vmatprep.mubr.msk.f32.mxu1 %vm218_vm0, %v240_v51 }
 0x33a   :  { %v3919_v52 = vpop.eup %3918 }
 0x33b   :  { %v241_v53 = vmul.f32 %v3919_v52, %v3915_v45 }
 0x33d   :  { %3043 = vmatmul.mubr.msk.f32.vlgmr.msra.gmra.mrb[2].mxu1 %vm218_vm0, %v241_v53 }
 0x33e   :  { %3531 = vmatpush3.bf16.msra.mxu1 %v4121_v3  ;;  %3077 = vmatprep.mubr.f32.mxu1 %v330_v54 }
 0x33f   :  { %3533 = vmatprep.subr.bf16.mxu1 %v4123_v5 }
 0x342   :  { %3535 = vmatpush3.bf16.msra.mxu1 %v4123_v5 }
 0x343   :  { %3537 = vmatprep.subr.bf16.mxu1 %v4128_v8 }
 0x346   :  { %3539 = vmatpush3.bf16.msra.mxu1 %v4128_v8 }
 0x347   :  { %3541 = vmatprep.subr.bf16.mxu1 %v4134_v14 }
 0x34a   :  { %3543 = vmatpush3.bf16.msra.mxu1 %v4134_v14 }
 0x34b   :  { %3545 = vmatprep.subr.bf16.mxu1 %v4138_v17 }
 0x34e   :  { %3547 = vmatpush3.bf16.msra.mxu1 %v4138_v17 }
 0x34f   :  { %3549 = vmatprep.subr.bf16.mxu1 %v4142_v20 }
 0x352   :  { %3551 = vmatpush3.bf16.msra.mxu1 %v4142_v20 }
 0x353   :  { %3553 = vmatprep.subr.bf16.mxu1 %v4146_v23 }
 0x356   :  { %3555 = vmatpush3.bf16.msra.mxu1 %v4146_v23 }
 0x357   :  { %3557 = vmatprep.subr.bf16.mxu1 %v4150_v26 }
 0x35a   :  { %3559 = vmatpush3.bf16.msra.mxu1 %v4150_v26 }
 0x35d   :  { %3078 = vmatmul.mubr.f32.vlgmr.msra.gmra.mrb[4].mxu1 %v331_v55 }
 0x410   :  { %v3044_v56 = vpop.f32.mrb[2].mxu1 }
 0x411   :  { %328 = vst [vmem:[#allocation7 + $0x8] sm:$0x7f] %v3044_v56  ;;  %v318_v57 = vpop.f32.mrb[3].mxu1 }
 0x412   :  { %327 = vst [vmem:[#allocation7] sm:$0xff] %v318_v57 }
 0x430   :  { %v3079_v58 = vpop.f32.mrb[4].mxu1 }
 0x431   :  { %v404_v59 = vadd.f32 %v3079_v58, %v4158_v27  ;;  %v398_v60 = vpop.f32.mrb[5].mxu1 }
 0x432   :  { %v399_v61 = vadd.f32 %v4158_v27, %v398_v60  ;;  %v854_v60 = vld [vmem:[#allocation2 + $0x30] sm:$0xff] }
 0x434   :  { %v3560_v63 = vpack.c.bf16 %v404_v59, %v399_v61  ;;  %3084 = vmatprep.mubr.f32.mxu0 %v399_v61  ;;  %v855_v61 = vld [vmem:[#allocation2 + $0x38] sm:$0x7f] }
 0x436   :  { %3561 = vmatprep.subr.bf16.mxu0 %v3560_v63 }
 0x437   :  { %3563 = vmatpush3.bf16.xpose.msra.mxu0 %v3560_v63 }
 0x438   :  { %3566 = vmatprep.subr.msk.bf16.mxu0 %vm4166_vm4, %v3564_v62 }
 0x43e   :  { %3085 = vmatmul.mubr.f32.vlgmr.msra.gmra.mrb[2].mxu0 %v404_v59 }
 0x43f   :  { %3569 = vmatpush3.bf16.msk.msra.mxu0 %vm4166_vm4, %v3564_v62 }
 0x440   :  { %3571 = vmatprep.subr.bf16.mxu0 %v4121_v3 }
 0x511   :  { %v3086_v0 = vpop.f32.mrb[2].mxu0 }
 0x512   :  { %v473_v1 = vpop.f32.mrb[3].mxu0  ;;  %v485_v2 = vsel %vm222_vm1, %v3086_v0, -inf }
 0x513   :  { %486 = vmax.xlane.f32.xlu1 %v485_v2  ;;  %v482_v4 = vsel %vm218_vm0, %v473_v1, -inf }
 0x514   :  { %483 = vmax.xlane.f32.xlu0 %v482_v4 }
 0x5a0   :  { %v487_v6 = vpop.xlane.xlu1 %486 }
 0x5a1   :  { %v489_v7 = vsub.f32 %v3086_v0, %v487_v6  ;;  %v484_v9 = vpop.xlane.xlu0 %483  ;;  %v3648_v6 = vpack.c.bf16 %v855_v61, %v854_v60 }
 0x5a2   :  { %v488_v10 = vsub.f32 %v473_v1, %v484_v9 }
 0x5a3   :  { %v492_v11 = vmul.f32 1.442695, %v489_v7 }
 0x5a4   :  { %v490_v12 = vmul.f32 1.442695, %v488_v10 }
 0x5a5   :  { %3920 = vpow2.f32 %v492_v11 }
 0x5a6   :  { %3922 = vpow2.f32 %v490_v12 }
 0x5af   :  { %v3921_v13 = vpop.eup %3920 }
 0x5b0   :  { %v3923_v15 = vpop.eup %3922  ;;  %v497_v16 = vsel %vm222_vm1, %v3921_v13, 0.0 }
 0x5b1   :  { %498 = vadd.xlane.f32.xlu1 %v497_v16  ;;  %v494_v18 = vsel %vm218_vm0, %v3923_v15, 0.0 }
 0x5b2   :  { %495 = vadd.xlane.f32.xlu0 %v494_v18 }
 0x63e   :  { %v499_v19 = vpop.xlane.xlu1 %498 }
 0x63f   :  { %3924 = vrcp.f32 %v499_v19  ;;  %v496_v21 = vpop.xlane.xlu0 %495 }
 0x640   :  { %3926 = vrcp.f32 %v496_v21 }
 0x649   :  { %v3925_v22 = vpop.eup %3924 }
 0x64a   :  { %v3927_v24 = vpop.eup %3926  ;;  %v503_v28 = vmul.f32 %v3925_v22, %v3921_v13 }
 0x64b   :  { %v502_v25 = vmul.f32 %v3927_v24, %v3923_v15 }
 0x64d   :  { %3091 = vmatprep.mubr.msk.f32.mxu0 %vm218_vm0, %v502_v25 }
 0x64e   :  { %3092 = vmatmul.mubr.msk.f32.vlgmr.msra.gmra.mrb[4].mxu0 %vm218_vm0, %v503_v28 }
 0x64f   :  { %3573 = vmatpush3.bf16.msra.mxu0 %v4121_v3  ;;  %3126 = vmatprep.mubr.f32.mxu0 %v592_v29 }
 0x650   :  { %3575 = vmatprep.subr.bf16.mxu0 %v4123_v5 }
 0x653   :  { %3577 = vmatpush3.bf16.msra.mxu0 %v4123_v5 }
 0x654   :  { %3579 = vmatprep.subr.bf16.mxu0 %v4128_v8 }
 0x657   :  { %3581 = vmatpush3.bf16.msra.mxu0 %v4128_v8 }
 0x658   :  { %3583 = vmatprep.subr.bf16.mxu0 %v4134_v14 }
 0x65b   :  { %3585 = vmatpush3.bf16.msra.mxu0 %v4134_v14 }
 0x65c   :  { %3587 = vmatprep.subr.bf16.mxu0 %v4138_v17 }
 0x65f   :  { %3589 = vmatpush3.bf16.msra.mxu0 %v4138_v17 }
 0x660   :  { %3591 = vmatprep.subr.bf16.mxu0 %v4142_v20 }
 0x663   :  { %3593 = vmatpush3.bf16.msra.mxu0 %v4142_v20 }
 0x664   :  { %3595 = vmatprep.subr.bf16.mxu0 %v4146_v23 }
 0x667   :  { %3597 = vmatpush3.bf16.msra.mxu0 %v4146_v23 }
 0x668   :  { %3599 = vmatprep.subr.bf16.mxu0 %v4150_v26 }
 0x66b   :  { %3601 = vmatpush3.bf16.msra.mxu0 %v4150_v26 }
 0x66e   :  { %3127 = vmatmul.mubr.f32.vlgmr.msra.gmra.mrb[6].mxu0 %v593_v30 }
 0x721   :  { %v3093_v31 = vpop.f32.mrb[4].mxu0 }
 0x722   :  { %590 = vst [vmem:[#allocation7 + $0x18] sm:$0x7f] %v3093_v31  ;;  %v579_v32 = vpop.f32.mrb[5].mxu0 }
 0x723   :  { %589 = vst [vmem:[#allocation7 + $0x10] sm:$0xff] %v579_v32 }
 0x741   :  { %v3128_v33 = vpop.f32.mrb[6].mxu0 }
 0x742   :  { %v666_v34 = vadd.f32 %v3128_v33, %v4158_v27  ;;  %v660_v35 = vpop.f32.mrb[7].mxu0 }
 0x743   :  { %v661_v36 = vadd.f32 %v4158_v27, %v660_v35  ;;  %v1116_v35 = vld [vmem:[#allocation2 + $0x40] sm:$0xff] }
 0x745   :  { %v3602_v38 = vpack.c.bf16 %v666_v34, %v661_v36  ;;  %3133 = vmatprep.mubr.f32.mxu1 %v661_v36  ;;  %v1117_v36 = vld [vmem:[#allocation2 + $0x48] sm:$0x7f] }
 0x747   :  { %3603 = vmatprep.subr.bf16.mxu1 %v3602_v38 }
 0x748   :  { %3605 = vmatpush3.bf16.xpose.msra.mxu1 %v3602_v38 }
 0x749   :  { %3608 = vmatprep.subr.msk.bf16.mxu1 %vm4166_vm4, %v3606_v37 }
 0x74f   :  { %3134 = vmatmul.mubr.f32.vlgmr.msra.gmra.mrb[6].mxu1 %v666_v34 }
 0x750   :  { %3611 = vmatpush3.bf16.msk.msra.mxu1 %vm4166_vm4, %v3606_v37 }
 0x751   :  { %3613 = vmatprep.subr.bf16.mxu1 %v4121_v3 }
 0x822   :  { %v3135_v39 = vpop.f32.mrb[6].mxu1 }
 0x823   :  { %v735_v40 = vpop.f32.mrb[7].mxu1  ;;  %v747_v41 = vsel %vm222_vm1, %v3135_v39, -inf }
 0x824   :  { %748 = vmax.xlane.f32.xlu1 %v747_v41  ;;  %v744_v42 = vsel %vm218_vm0, %v735_v40, -inf }
 0x825   :  { %745 = vmax.xlane.f32.xlu0 %v744_v42 }
 0x8b1   :  { %v749_v43 = vpop.xlane.xlu1 %748 }
 0x8b2   :  { %v751_v44 = vsub.f32 %v3135_v39, %v749_v43  ;;  %v746_v45 = vpop.xlane.xlu0 %745  ;;  %v3690_v43 = vpack.c.bf16 %v1117_v36, %v1116_v35 }
 0x8b3   :  { %v750_v46 = vsub.f32 %v735_v40, %v746_v45 }
 0x8b4   :  { %v754_v48 = vmul.f32 1.442695, %v751_v44 }
 0x8b5   :  { %v752_v49 = vmul.f32 1.442695, %v750_v46 }
 0x8b6   :  { %3928 = vpow2.f32 %v754_v48 }
 0x8b7   :  { %3930 = vpow2.f32 %v752_v49 }
 0x8c0   :  { %v3929_v50 = vpop.eup %3928 }
 0x8c1   :  { %v3931_v51 = vpop.eup %3930  ;;  %v759_v52 = vsel %vm222_vm1, %v3929_v50, 0.0 }
 0x8c2   :  { %760 = vadd.xlane.f32.xlu1 %v759_v52  ;;  %v756_v53 = vsel %vm218_vm0, %v3931_v51, 0.0 }
 0x8c3   :  { %757 = vadd.xlane.f32.xlu0 %v756_v53 }
 0x94f   :  { %v761_v54 = vpop.xlane.xlu1 %760 }
 0x950   :  { %3932 = vrcp.f32 %v761_v54  ;;  %v758_v55 = vpop.xlane.xlu0 %757 }
 0x951   :  { %3934 = vrcp.f32 %v758_v55 }
 0x95a   :  { %v3933_v56 = vpop.eup %3932 }
 0x95b   :  { %v3935_v57 = vpop.eup %3934  ;;  %v765_v59 = vmul.f32 %v3933_v56, %v3929_v50 }
 0x95c   :  { %v764_v58 = vmul.f32 %v3935_v57, %v3931_v51 }
 0x95e   :  { %3140 = vmatprep.mubr.msk.f32.mxu1 %vm218_vm0, %v764_v58 }
 0x95f   :  { %3141 = vmatmul.mubr.msk.f32.vlgmr.msra.gmra.mrb[8].mxu1 %vm218_vm0, %v765_v59 }
 0x960   :  { %3615 = vmatpush3.bf16.msra.mxu1 %v4121_v3  ;;  %3175 = vmatprep.mubr.f32.mxu1 %v854_v60 }
 0x961   :  { %3617 = vmatprep.subr.bf16.mxu1 %v4123_v5 }
 0x964   :  { %3619 = vmatpush3.bf16.msra.mxu1 %v4123_v5 }
 0x965   :  { %3621 = vmatprep.subr.bf16.mxu1 %v4128_v8 }
 0x968   :  { %3623 = vmatpush3.bf16.msra.mxu1 %v4128_v8 }
 0x969   :  { %3625 = vmatprep.subr.bf16.mxu1 %v4134_v14 }
 0x96c   :  { %3627 = vmatpush3.bf16.msra.mxu1 %v4134_v14 }
 0x96d   :  { %3629 = vmatprep.subr.bf16.mxu1 %v4138_v17 }
 0x970   :  { %3631 = vmatpush3.bf16.msra.mxu1 %v4138_v17 }
 0x971   :  { %3633 = vmatprep.subr.bf16.mxu1 %v4142_v20 }
 0x974   :  { %3635 = vmatpush3.bf16.msra.mxu1 %v4142_v20 }
 0x975   :  { %3637 = vmatprep.subr.bf16.mxu1 %v4146_v23 }
 0x978   :  { %3639 = vmatpush3.bf16.msra.mxu1 %v4146_v23 }
 0x979   :  { %3641 = vmatprep.subr.bf16.mxu1 %v4150_v26 }
 0x97c   :  { %3643 = vmatpush3.bf16.msra.mxu1 %v4150_v26 }
 0x97f   :  { %3176 = vmatmul.mubr.f32.vlgmr.msra.gmra.mrb[10].mxu1 %v855_v61 }
 0xa32   :  { %v3142_v62 = vpop.f32.mrb[8].mxu1 }
 0xa33   :  { %852 = vst [vmem:[#allocation7 + $0x28] sm:$0x7f] %v3142_v62  ;;  %v841_v63 = vpop.f32.mrb[9].mxu1 }
 0xa34   :  { %851 = vst [vmem:[#allocation7 + $0x20] sm:$0xff] %v841_v63 }
 0xa52   :  { %v3177_v0 = vpop.f32.mrb[10].mxu1 }
 0xa53   :  { %v928_v1 = vadd.f32 %v3177_v0, %v4158_v27  ;;  %v922_v2 = vpop.f32.mrb[11].mxu1 }
 0xa54   :  { %v923_v4 = vadd.f32 %v4158_v27, %v922_v2  ;;  %v1378_v2 = vld [vmem:[#allocation2 + $0x50] sm:$0xff] }
 0xa56   :  { %v3644_v7 = vpack.c.bf16 %v928_v1, %v923_v4  ;;  %3182 = vmatprep.mubr.f32.mxu0 %v923_v4  ;;  %v1379_v4 = vld [vmem:[#allocation2 + $0x58] sm:$0x7f] }
 0xa58   :  { %3645 = vmatprep.subr.bf16.mxu0 %v3644_v7 }
 0xa59   :  { %3647 = vmatpush3.bf16.xpose.msra.mxu0 %v3644_v7 }
 0xa5a   :  { %3650 = vmatprep.subr.msk.bf16.mxu0 %vm4166_vm4, %v3648_v6 }
 0xa60   :  { %3183 = vmatmul.mubr.f32.vlgmr.msra.gmra.mrb[8].mxu0 %v928_v1 }
 0xa61   :  { %3653 = vmatpush3.bf16.msk.msra.mxu0 %vm4166_vm4, %v3648_v6 }
 0xa62   :  { %3655 = vmatprep.subr.bf16.mxu0 %v4121_v3 }
 0xb33   :  { %v3184_v9 = vpop.f32.mrb[8].mxu0 }
 0xb34   :  { %v997_v10 = vpop.f32.mrb[9].mxu0  ;;  %v1009_v11 = vsel %vm222_vm1, %v3184_v9, -inf }
 0xb35   :  { %1010 = vmax.xlane.f32.xlu1 %v1009_v11  ;;  %v1006_v12 = vsel %vm218_vm0, %v997_v10, -inf }
 0xb36   :  { %1007 = vmax.xlane.f32.xlu0 %v1006_v12 }
 0xbc2   :  { %v1011_v13 = vpop.xlane.xlu1 %1010 }
 0xbc3   :  { %v1013_v15 = vsub.f32 %v3184_v9, %v1011_v13  ;;  %v1008_v16 = vpop.xlane.xlu0 %1007  ;;  %v3732_v13 = vpack.c.bf16 %v1379_v4, %v1378_v2 }
 0xbc4   :  { %v1012_v18 = vsub.f32 %v997_v10, %v1008_v16 }
 0xbc5   :  { %v1016_v19 = vmul.f32 1.442695, %v1013_v15 }
 0xbc6   :  { %v1014_v21 = vmul.f32 1.442695, %v1012_v18 }
 0xbc7   :  { %3936 = vpow2.f32 %v1016_v19 }
 0xbc8   :  { %3938 = vpow2.f32 %v1014_v21 }
 0xbd1   :  { %v3937_v22 = vpop.eup %3936 }
 0xbd2   :  { %v3939_v24 = vpop.eup %3938  ;;  %v1021_v25 = vsel %vm222_vm1, %v3937_v22, 0.0 }
 0xbd3   :  { %1022 = vadd.xlane.f32.xlu1 %v1021_v25  ;;  %v1018_v28 = vsel %vm218_vm0, %v3939_v24, 0.0 }
 0xbd4   :  { %1019 = vadd.xlane.f32.xlu0 %v1018_v28 }
 0xc60   :  { %v1023_v29 = vpop.xlane.xlu1 %1022 }
 0xc61   :  { %3940 = vrcp.f32 %v1023_v29  ;;  %v1020_v30 = vpop.xlane.xlu0 %1019 }
 0xc62   :  { %3942 = vrcp.f32 %v1020_v30 }
 0xc6b   :  { %v3941_v31 = vpop.eup %3940 }
 0xc6c   :  { %v3943_v32 = vpop.eup %3942  ;;  %v1027_v34 = vmul.f32 %v3941_v31, %v3937_v22 }
 0xc6d   :  { %v1026_v33 = vmul.f32 %v3943_v32, %v3939_v24 }
 0xc6f   :  { %3189 = vmatprep.mubr.msk.f32.mxu0 %vm218_vm0, %v1026_v33 }
 0xc70   :  { %3190 = vmatmul.mubr.msk.f32.vlgmr.msra.gmra.mrb[10].mxu0 %vm218_vm0, %v1027_v34 }
 0xc71   :  { %3657 = vmatpush3.bf16.msra.mxu0 %v4121_v3  ;;  %3224 = vmatprep.mubr.f32.mxu0 %v1116_v35 }
 0xc72   :  { %3659 = vmatprep.subr.bf16.mxu0 %v4123_v5 }
 0xc75   :  { %3661 = vmatpush3.bf16.msra.mxu0 %v4123_v5 }
 0xc76   :  { %3663 = vmatprep.subr.bf16.mxu0 %v4128_v8 }
 0xc79   :  { %3665 = vmatpush3.bf16.msra.mxu0 %v4128_v8 }
 0xc7a   :  { %3667 = vmatprep.subr.bf16.mxu0 %v4134_v14 }
 0xc7d   :  { %3669 = vmatpush3.bf16.msra.mxu0 %v4134_v14 }
 0xc7e   :  { %3671 = vmatprep.subr.bf16.mxu0 %v4138_v17 }
 0xc81   :  { %3673 = vmatpush3.bf16.msra.mxu0 %v4138_v17 }
 0xc82   :  { %3675 = vmatprep.subr.bf16.mxu0 %v4142_v20 }
 0xc85   :  { %3677 = vmatpush3.bf16.msra.mxu0 %v4142_v20 }
 0xc86   :  { %3679 = vmatprep.subr.bf16.mxu0 %v4146_v23 }
 0xc89   :  { %3681 = vmatpush3.bf16.msra.mxu0 %v4146_v23 }
 0xc8a   :  { %3683 = vmatprep.subr.bf16.mxu0 %v4150_v26 }
 0xc8d   :  { %3685 = vmatpush3.bf16.msra.mxu0 %v4150_v26 }
 0xc90   :  { %3225 = vmatmul.mubr.f32.vlgmr.msra.gmra.mrb[12].mxu0 %v1117_v36 }
 0xd43   :  { %v3191_v37 = vpop.f32.mrb[10].mxu0 }
 0xd44   :  { %1114 = vst [vmem:[#allocation7 + $0x38] sm:$0x7f] %v3191_v37  ;;  %v1103_v38 = vpop.f32.mrb[11].mxu0 }
 0xd45   :  { %1113 = vst [vmem:[#allocation7 + $0x30] sm:$0xff] %v1103_v38 }
 0xd63   :  { %v3226_v39 = vpop.f32.mrb[12].mxu0 }
 0xd64   :  { %v1190_v40 = vadd.f32 %v3226_v39, %v4158_v27  ;;  %v1184_v41 = vpop.f32.mrb[13].mxu0 }
 0xd65   :  { %v1185_v42 = vadd.f32 %v4158_v27, %v1184_v41  ;;  %v1640_v41 = vld [vmem:[#allocation2 + $0x60] sm:$0xff] }
 0xd67   :  { %v3686_v44 = vpack.c.bf16 %v1190_v40, %v1185_v42  ;;  %3231 = vmatprep.mubr.f32.mxu1 %v1185_v42  ;;  %v1641_v42 = vld [vmem:[#allocation2 + $0x68] sm:$0x7f] }
 0xd69   :  { %3687 = vmatprep.subr.bf16.mxu1 %v3686_v44 }
 0xd6a   :  { %3689 = vmatpush3.bf16.xpose.msra.mxu1 %v3686_v44 }
 0xd6b   :  { %3692 = vmatprep.subr.msk.bf16.mxu1 %vm4166_vm4, %v3690_v43 }
 0xd71   :  { %3232 = vmatmul.mubr.f32.vlgmr.msra.gmra.mrb[12].mxu1 %v1190_v40 }
 0xd72   :  { %3695 = vmatpush3.bf16.msk.msra.mxu1 %vm4166_vm4, %v3690_v43 }
 0xd73   :  { %3697 = vmatprep.subr.bf16.mxu1 %v4121_v3 }
 0xe44   :  { %v3233_v45 = vpop.f32.mrb[12].mxu1 }
 0xe45   :  { %v1259_v46 = vpop.f32.mrb[13].mxu1  ;;  %v1271_v48 = vsel %vm222_vm1, %v3233_v45, -inf }
 0xe46   :  { %1272 = vmax.xlane.f32.xlu1 %v1271_v48  ;;  %v1268_v49 = vsel %vm218_vm0, %v1259_v46, -inf }
 0xe47   :  { %1269 = vmax.xlane.f32.xlu0 %v1268_v49 }
 0xed3   :  { %v1273_v50 = vpop.xlane.xlu1 %1272 }
 0xed4   :  { %v1275_v51 = vsub.f32 %v3233_v45, %v1273_v50  ;;  %v1270_v52 = vpop.xlane.xlu0 %1269  ;;  %v3774_v50 = vpack.c.bf16 %v1641_v42, %v1640_v41 }
 0xed5   :  { %v1274_v53 = vsub.f32 %v1259_v46, %v1270_v52 }
 0xed6   :  { %v1278_v54 = vmul.f32 1.442695, %v1275_v51 }
 0xed7   :  { %v1276_v55 = vmul.f32 1.442695, %v1274_v53 }
 0xed8   :  { %3944 = vpow2.f32 %v1278_v54 }
 0xed9   :  { %3946 = vpow2.f32 %v1276_v55 }
 0xee2   :  { %v3945_v56 = vpop.eup %3944 }
 0xee3   :  { %v3947_v57 = vpop.eup %3946  ;;  %v1283_v58 = vsel %vm222_vm1, %v3945_v56, 0.0 }
 0xee4   :  { %1284 = vadd.xlane.f32.xlu1 %v1283_v58  ;;  %v1280_v59 = vsel %vm218_vm0, %v3947_v57, 0.0 }
 0xee5   :  { %1281 = vadd.xlane.f32.xlu0 %v1280_v59 }
 0xf71   :  { %v1285_v60 = vpop.xlane.xlu1 %1284 }
 0xf72   :  { %3948 = vrcp.f32 %v1285_v60  ;;  %v1282_v61 = vpop.xlane.xlu0 %1281 }
 0xf73   :  { %3950 = vrcp.f32 %v1282_v61 }
 0xf7c   :  { %v3949_v62 = vpop.eup %3948 }
 0xf7d   :  { %v3951_v63 = vpop.eup %3950  ;;  %v1289_v1 = vmul.f32 %v3949_v62, %v3945_v56 }
 0xf7e   :  { %v1288_v0 = vmul.f32 %v3951_v63, %v3947_v57 }
 0xf80   :  { %3238 = vmatprep.mubr.msk.f32.mxu1 %vm218_vm0, %v1288_v0 }
 0xf81   :  { %3239 = vmatmul.mubr.msk.f32.vlgmr.msra.gmra.mrb[14].mxu1 %vm218_vm0, %v1289_v1 }
 0xf82   :  { %3699 = vmatpush3.bf16.msra.mxu1 %v4121_v3  ;;  %3273 = vmatprep.mubr.f32.mxu1 %v1378_v2 }
 0xf83   :  { %3701 = vmatprep.subr.bf16.mxu1 %v4123_v5 }
 0xf86   :  { %3703 = vmatpush3.bf16.msra.mxu1 %v4123_v5 }
 0xf87   :  { %3705 = vmatprep.subr.bf16.mxu1 %v4128_v8 }
 0xf8a   :  { %3707 = vmatpush3.bf16.msra.mxu1 %v4128_v8 }
 0xf8b   :  { %3709 = vmatprep.subr.bf16.mxu1 %v4134_v14 }
 0xf8e   :  { %3711 = vmatpush3.bf16.msra.mxu1 %v4134_v14 }
 0xf8f   :  { %3713 = vmatprep.subr.bf16.mxu1 %v4138_v17 }
 0xf92   :  { %3715 = vmatpush3.bf16.msra.mxu1 %v4138_v17 }
 0xf93   :  { %3717 = vmatprep.subr.bf16.mxu1 %v4142_v20 }
 0xf96   :  { %3719 = vmatpush3.bf16.msra.mxu1 %v4142_v20 }
 0xf97   :  { %3721 = vmatprep.subr.bf16.mxu1 %v4146_v23 }
 0xf9a   :  { %3723 = vmatpush3.bf16.msra.mxu1 %v4146_v23 }
 0xf9b   :  { %3725 = vmatprep.subr.bf16.mxu1 %v4150_v26 }
 0xf9e   :  { %3727 = vmatpush3.bf16.msra.mxu1 %v4150_v26 }
 0xfa1   :  { %3274 = vmatmul.mubr.f32.vlgmr.msra.gmra.mrb[16].mxu1 %v1379_v4 }
0x1054   :  { %v3240_v6 = vpop.f32.mrb[14].mxu1 }
0x1055   :  { %1376 = vst [vmem:[#allocation7 + $0x48] sm:$0x7f] %v3240_v6  ;;  %v1365_v7 = vpop.f32.mrb[15].mxu1 }
0x1056   :  { %1375 = vst [vmem:[#allocation7 + $0x40] sm:$0xff] %v1365_v7 }
0x1074   :  { %v3275_v9 = vpop.f32.mrb[16].mxu1 }
0x1075   :  { %v1452_v10 = vadd.f32 %v3275_v9, %v4158_v27  ;;  %v1446_v11 = vpop.f32.mrb[17].mxu1 }
0x1076   :  { %v1447_v12 = vadd.f32 %v4158_v27, %v1446_v11  ;;  %v1902_v11 = vld [vmem:[#allocation2 + $0x70] sm:$0xff] }
0x1078   :  { %v3728_v15 = vpack.c.bf16 %v1452_v10, %v1447_v12  ;;  %3280 = vmatprep.mubr.f32.mxu0 %v1447_v12  ;;  %v1903_v12 = vld [vmem:[#allocation2 + $0x78] sm:$0x7f] }
0x107a   :  { %3729 = vmatprep.subr.bf16.mxu0 %v3728_v15 }
0x107b   :  { %3731 = vmatpush3.bf16.xpose.msra.mxu0 %v3728_v15 }
0x107c   :  { %3734 = vmatprep.subr.msk.bf16.mxu0 %vm4166_vm4, %v3732_v13 }
0x1082   :  { %3281 = vmatmul.mubr.f32.vlgmr.msra.gmra.mrb[14].mxu0 %v1452_v10 }
0x1083   :  { %3737 = vmatpush3.bf16.msk.msra.mxu0 %vm4166_vm4, %v3732_v13 }
0x1084   :  { %3739 = vmatprep.subr.bf16.mxu0 %v4121_v3 }
0x1155   :  { %v3282_v16 = vpop.f32.mrb[14].mxu0 }
0x1156   :  { %v1521_v18 = vpop.f32.mrb[15].mxu0  ;;  %v1533_v19 = vsel %vm222_vm1, %v3282_v16, -inf }
0x1157   :  { %1534 = vmax.xlane.f32.xlu1 %v1533_v19  ;;  %v1530_v21 = vsel %vm218_vm0, %v1521_v18, -inf }
0x1158   :  { %1531 = vmax.xlane.f32.xlu0 %v1530_v21 }
0x11e4   :  { %v1535_v22 = vpop.xlane.xlu1 %1534 }
0x11e5   :  { %v1537_v24 = vsub.f32 %v3282_v16, %v1535_v22  ;;  %v1532_v25 = vpop.xlane.xlu0 %1531  ;;  %v3816_v22 = vpack.c.bf16 %v1903_v12, %v1902_v11 }
0x11e6   :  { %v1536_v28 = vsub.f32 %v1521_v18, %v1532_v25 }
0x11e7   :  { %v1540_v29 = vmul.f32 1.442695, %v1537_v24 }
0x11e8   :  { %v1538_v30 = vmul.f32 1.442695, %v1536_v28 }
0x11e9   :  { %3952 = vpow2.f32 %v1540_v29 }
0x11ea   :  { %3954 = vpow2.f32 %v1538_v30 }
0x11f3   :  { %v3953_v31 = vpop.eup %3952 }
0x11f4   :  { %v3955_v32 = vpop.eup %3954  ;;  %v1545_v33 = vsel %vm222_vm1, %v3953_v31, 0.0 }
0x11f5   :  { %1546 = vadd.xlane.f32.xlu1 %v1545_v33  ;;  %v1542_v34 = vsel %vm218_vm0, %v3955_v32, 0.0 }
0x11f6   :  { %1543 = vadd.xlane.f32.xlu0 %v1542_v34 }
0x1282   :  { %v1547_v35 = vpop.xlane.xlu1 %1546 }
0x1283   :  { %3956 = vrcp.f32 %v1547_v35  ;;  %v1544_v36 = vpop.xlane.xlu0 %1543 }
0x1284   :  { %3958 = vrcp.f32 %v1544_v36 }
0x128d   :  { %v3957_v37 = vpop.eup %3956 }
0x128e   :  { %v3959_v38 = vpop.eup %3958  ;;  %v1551_v40 = vmul.f32 %v3957_v37, %v3953_v31 }
0x128f   :  { %v1550_v39 = vmul.f32 %v3959_v38, %v3955_v32 }
0x1291   :  { %3287 = vmatprep.mubr.msk.f32.mxu0 %vm218_vm0, %v1550_v39 }
0x1292   :  { %3288 = vmatmul.mubr.msk.f32.vlgmr.msra.gmra.mrb[16].mxu0 %vm218_vm0, %v1551_v40 }
0x1293   :  { %3741 = vmatpush3.bf16.msra.mxu0 %v4121_v3  ;;  %3322 = vmatprep.mubr.f32.mxu0 %v1640_v41 }
0x1294   :  { %3743 = vmatprep.subr.bf16.mxu0 %v4123_v5 }
0x1297   :  { %3745 = vmatpush3.bf16.msra.mxu0 %v4123_v5 }
0x1298   :  { %3747 = vmatprep.subr.bf16.mxu0 %v4128_v8 }
0x129b   :  { %3749 = vmatpush3.bf16.msra.mxu0 %v4128_v8 }
0x129c   :  { %3751 = vmatprep.subr.bf16.mxu0 %v4134_v14 }
0x129f   :  { %3753 = vmatpush3.bf16.msra.mxu0 %v4134_v14 }
0x12a0   :  { %3755 = vmatprep.subr.bf16.mxu0 %v4138_v17 }
0x12a3   :  { %3757 = vmatpush3.bf16.msra.mxu0 %v4138_v17 }
0x12a4   :  { %3759 = vmatprep.subr.bf16.mxu0 %v4142_v20 }
0x12a7   :  { %3761 = vmatpush3.bf16.msra.mxu0 %v4142_v20 }
0x12a8   :  { %3763 = vmatprep.subr.bf16.mxu0 %v4146_v23 }
0x12ab   :  { %3765 = vmatpush3.bf16.msra.mxu0 %v4146_v23 }
0x12ac   :  { %3767 = vmatprep.subr.bf16.mxu0 %v4150_v26 }
0x12af   :  { %3769 = vmatpush3.bf16.msra.mxu0 %v4150_v26 }
0x12b2   :  { %3323 = vmatmul.mubr.f32.vlgmr.msra.gmra.mrb[18].mxu0 %v1641_v42 }
0x1365   :  { %v3289_v43 = vpop.f32.mrb[16].mxu0 }
0x1366   :  { %1638 = vst [vmem:[#allocation7 + $0x58] sm:$0x7f] %v3289_v43  ;;  %v1627_v44 = vpop.f32.mrb[17].mxu0 }
0x1367   :  { %1637 = vst [vmem:[#allocation7 + $0x50] sm:$0xff] %v1627_v44 }
0x1385   :  { %v3324_v45 = vpop.f32.mrb[18].mxu0 }
0x1386   :  { %v1714_v46 = vadd.f32 %v3324_v45, %v4158_v27  ;;  %v1708_v48 = vpop.f32.mrb[19].mxu0 }
0x1387   :  { %v1709_v49 = vadd.f32 %v4158_v27, %v1708_v48  ;;  %v2165_v48 = vld [vmem:[#allocation2 + $0x88] sm:$0x7f] }
0x1389   :  { %v3770_v51 = vpack.c.bf16 %v1714_v46, %v1709_v49  ;;  %3329 = vmatprep.mubr.f32.mxu1 %v1709_v49 }
0x138b   :  { %3771 = vmatprep.subr.bf16.mxu1 %v3770_v51 }
0x138c   :  { %3773 = vmatpush3.bf16.xpose.msra.mxu1 %v3770_v51 }
0x138d   :  { %3776 = vmatprep.subr.msk.bf16.mxu1 %vm4166_vm4, %v3774_v50 }
0x1393   :  { %3330 = vmatmul.mubr.f32.vlgmr.msra.gmra.mrb[18].mxu1 %v1714_v46  ;;  %v2164_v46 = vld [vmem:[#allocation2 + $0x80] sm:$0xff] }
0x1394   :  { %3779 = vmatpush3.bf16.msk.msra.mxu1 %vm4166_vm4, %v3774_v50 }
0x1395   :  { %3781 = vmatprep.subr.bf16.mxu1 %v4121_v3 }
0x1466   :  { %v3331_v52 = vpop.f32.mrb[18].mxu1 }
0x1467   :  { %v1783_v53 = vpop.f32.mrb[19].mxu1  ;;  %v1795_v54 = vsel %vm222_vm1, %v3331_v52, -inf }
0x1468   :  { %1796 = vmax.xlane.f32.xlu1 %v1795_v54  ;;  %v1792_v55 = vsel %vm218_vm0, %v1783_v53, -inf }
0x1469   :  { %1793 = vmax.xlane.f32.xlu0 %v1792_v55 }
0x14f5   :  { %v1797_v56 = vpop.xlane.xlu1 %1796 }
0x14f6   :  { %v1799_v57 = vsub.f32 %v3331_v52, %v1797_v56  ;;  %v1794_v58 = vpop.xlane.xlu0 %1793  ;;  %v4393_v52 = vld [vmem:[%s4452_s2] ss:$0 sm:$0xff]  ;;  %v3858_v56 = vpack.c.bf16 %v2165_v48, %v2164_v46  ;;  %s4070_s2 = smov [#allocation7]  }
0x14f7   :  { %v1798_v59 = vsub.f32 %v1783_v53, %v1794_v58  ;;  %s2692_s13 = sshll.u32 %s4070_s2, 4  ;;  %s2693_s13 = int_to_ptr.vmem [resolvable:$true] %s2692_s13 }
0x14f8   :  { %v1802_v60 = vmul.f32 1.442695, %v1799_v57  ;;  %s4037_s14 = scalar_lea.vmem %s2693_s13, 2560  ;;  %p4042_p3 = scmp.lt.s32.totalorder %s2693_s13, %s2693_s13 }
0x14f9   :  { %v1800_v61 = vmul.f32 1.442695, %v1798_v59  ;;  %p4038_p2 = scmp.ne.s32.totalorder %s2693_s13, %s4037_s14  ;;  %p4043_p4 = scmp.lt.s32.totalorder %s4037_s14, %s4037_s14 }
0x14fa   :  { %3960 = vpow2.f32 %v1802_v60 }
0x14fb   :  { %3962 = vpow2.f32 %v1800_v61  ;;  %p4044_p5 = por %p4043_p4, %p4042_p3 }
0x14fd   :  { %p4045_p6 = pnand %p4044_p5, %p4038_p2 }
0x1504   :  { %v3961_v62 = vpop.eup %3960 }
0x1505   :  { %v3963_v63 = vpop.eup %3962  ;;  %v1807_v0 = vsel %vm222_vm1, %v3961_v62, 0.0 }
0x1506   :  { %1808 = vadd.xlane.f32.xlu1 %v1807_v0  ;;  %v1804_v1 = vsel %vm218_vm0, %v3963_v63, 0.0 }
0x1507   :  { %1805 = vadd.xlane.f32.xlu0 %v1804_v1 }
0x1593   :  { %v1809_v2 = vpop.xlane.xlu1 %1808 }
0x1594   :  { %3964 = vrcp.f32 %v1809_v2  ;;  %v1806_v4 = vpop.xlane.xlu0 %1805 }
0x1595   :  { %3966 = vrcp.f32 %v1806_v4 }
0x159e   :  { %v3965_v6 = vpop.eup %3964 }
0x159f   :  { %v3967_v7 = vpop.eup %3966  ;;  %v1813_v10 = vmul.f32 %v3965_v6, %v3961_v62 }
0x15a0   :  { %v1812_v9 = vmul.f32 %v3967_v7, %v3963_v63 }
0x15a2   :  { %3336 = vmatprep.mubr.msk.f32.mxu1 %vm218_vm0, %v1812_v9 }
0x15a3   :  { %3337 = vmatmul.mubr.msk.f32.vlgmr.msra.gmra.mrb[20].mxu1 %vm218_vm0, %v1813_v10 }
0x15a4   :  { %3783 = vmatpush3.bf16.msra.mxu1 %v4121_v3  ;;  %3371 = vmatprep.mubr.f32.mxu1 %v1902_v11 }
0x15a5   :  { %3785 = vmatprep.subr.bf16.mxu1 %v4123_v5 }
0x15a8   :  { %3787 = vmatpush3.bf16.msra.mxu1 %v4123_v5 }
0x15a9   :  { %3789 = vmatprep.subr.bf16.mxu1 %v4128_v8 }
0x15ac   :  { %3791 = vmatpush3.bf16.msra.mxu1 %v4128_v8 }
0x15ad   :  { %3793 = vmatprep.subr.bf16.mxu1 %v4134_v14 }
0x15b0   :  { %3795 = vmatpush3.bf16.msra.mxu1 %v4134_v14 }
0x15b1   :  { %3797 = vmatprep.subr.bf16.mxu1 %v4138_v17 }
0x15b4   :  { %3799 = vmatpush3.bf16.msra.mxu1 %v4138_v17 }
0x15b5   :  { %3801 = vmatprep.subr.bf16.mxu1 %v4142_v20 }
0x15b8   :  { %3803 = vmatpush3.bf16.msra.mxu1 %v4142_v20 }
0x15b9   :  { %3805 = vmatprep.subr.bf16.mxu1 %v4146_v23 }
0x15bc   :  { %3807 = vmatpush3.bf16.msra.mxu1 %v4146_v23 }
0x15bd   :  { %3809 = vmatprep.subr.bf16.mxu1 %v4150_v26 }
0x15c0   :  { %3811 = vmatpush3.bf16.msra.mxu1 %v4150_v26 }
0x15c3   :  { %3372 = vmatmul.mubr.f32.vlgmr.msra.gmra.mrb[22].mxu1 %v1903_v12 }
0x1676   :  { %v3338_v13 = vpop.f32.mrb[20].mxu1 }
0x1677   :  { %1900 = vst [vmem:[#allocation7 + $0x68] sm:$0x7f] %v3338_v13  ;;  %v1889_v15 = vpop.f32.mrb[21].mxu1 }
0x1678   :  { %1899 = vst [vmem:[#allocation7 + $0x60] sm:$0xff] %v1889_v15 }
0x1696   :  { %v3373_v16 = vpop.f32.mrb[22].mxu1 }
0x1697   :  { %v1976_v18 = vadd.f32 %v3373_v16, %v4158_v27  ;;  %v1970_v19 = vpop.f32.mrb[23].mxu1 }
0x1698   :  { %v1971_v21 = vadd.f32 %v4158_v27, %v1970_v19  ;;  %v2426_v19 = vld [vmem:[#allocation2 + $0x90] sm:$0xff] }
0x169a   :  { %v3812_v24 = vpack.c.bf16 %v1976_v18, %v1971_v21  ;;  %3378 = vmatprep.mubr.f32.mxu0 %v1971_v21 }
0x169c   :  { %3813 = vmatprep.subr.bf16.mxu0 %v3812_v24 }
0x169d   :  { %3815 = vmatpush3.bf16.xpose.msra.mxu0 %v3812_v24 }
0x169e   :  { %3818 = vmatprep.subr.msk.bf16.mxu0 %vm4166_vm4, %v3816_v22 }
0x16a4   :  { %3379 = vmatmul.mubr.f32.vlgmr.msra.gmra.mrb[20].mxu0 %v1976_v18 }
0x16a5   :  { %3821 = vmatpush3.bf16.msk.msra.mxu0 %vm4166_vm4, %v3816_v22 }
0x16a6   :  { %3823 = vmatprep.subr.bf16.mxu0 %v4121_v3 }
0x1777   :  { %v3380_v25 = vpop.f32.mrb[20].mxu0 }
0x1778   :  { %v2045_v28 = vpop.f32.mrb[21].mxu0  ;;  %v2057_v29 = vsel %vm222_vm1, %v3380_v25, -inf }
0x1779   :  { %2058 = vmax.xlane.f32.xlu1 %v2057_v29  ;;  %v2054_v27 = vsel %vm218_vm0, %v2045_v28, -inf }
0x177a   :  { %2055 = vmax.xlane.f32.xlu0 %v2054_v27 }
0x1806   :  { %v2059_v30 = vpop.xlane.xlu1 %2058 }
0x1807   :  { %v2061_v31 = vsub.f32 %v3380_v25, %v2059_v30  ;;  %v2056_v32 = vpop.xlane.xlu0 %2055 }
0x1808   :  { %v2060_v33 = vsub.f32 %v2045_v28, %v2056_v32 }
0x1809   :  { %v2064_v34 = vmul.f32 1.442695, %v2061_v31 }
0x180a   :  { %v2062_v35 = vmul.f32 1.442695, %v2060_v33 }
0x180b   :  { %3968 = vpow2.f32 %v2064_v34 }
0x180c   :  { %3970 = vpow2.f32 %v2062_v35 }
0x1815   :  { %v3969_v36 = vpop.eup %3968 }
0x1816   :  { %v3971_v37 = vpop.eup %3970  ;;  %v2069_v38 = vsel %vm222_vm1, %v3969_v36, 0.0 }
0x1817   :  { %2070 = vadd.xlane.f32.xlu1 %v2069_v38  ;;  %v2066_v39 = vsel %vm218_vm0, %v3971_v37, 0.0 }
0x1818   :  { %2067 = vadd.xlane.f32.xlu0 %v2066_v39 }
0x18a4   :  { %v2071_v40 = vpop.xlane.xlu1 %2070 }
0x18a5   :  { %3972 = vrcp.f32 %v2071_v40  ;;  %v2068_v41 = vpop.xlane.xlu0 %2067 }
0x18a6   :  { %3974 = vrcp.f32 %v2068_v41 }
0x18af   :  { %v3973_v42 = vpop.eup %3972 }
0x18b0   :  { %v3975_v43 = vpop.eup %3974  ;;  %v2075_v45 = vmul.f32 %v3973_v42, %v3969_v36 }
0x18b1   :  { %v2074_v44 = vmul.f32 %v3975_v43, %v3971_v37 }
0x18b3   :  { %3385 = vmatprep.mubr.msk.f32.mxu0 %vm218_vm0, %v2074_v44 }
0x18b4   :  { %3386 = vmatmul.mubr.msk.f32.vlgmr.msra.gmra.mrb[22].mxu0 %vm218_vm0, %v2075_v45 }
0x18b5   :  { %3825 = vmatpush3.bf16.msra.mxu0 %v4121_v3  ;;  %3420 = vmatprep.mubr.f32.mxu0 %v2164_v46 }
0x18b6   :  { %3827 = vmatprep.subr.bf16.mxu0 %v4123_v5 }
0x18b9   :  { %3829 = vmatpush3.bf16.msra.mxu0 %v4123_v5 }
0x18ba   :  { %3831 = vmatprep.subr.bf16.mxu0 %v4128_v8 }
0x18bd   :  { %3833 = vmatpush3.bf16.msra.mxu0 %v4128_v8 }
0x18be   :  { %3835 = vmatprep.subr.bf16.mxu0 %v4134_v14 }
0x18c1   :  { %3837 = vmatpush3.bf16.msra.mxu0 %v4134_v14 }
0x18c2   :  { %3839 = vmatprep.subr.bf16.mxu0 %v4138_v17 }
0x18c5   :  { %3841 = vmatpush3.bf16.msra.mxu0 %v4138_v17 }
0x18c6   :  { %3843 = vmatprep.subr.bf16.mxu0 %v4142_v20 }
0x18c9   :  { %3845 = vmatpush3.bf16.msra.mxu0 %v4142_v20 }
0x18ca   :  { %3847 = vmatprep.subr.bf16.mxu0 %v4146_v23 }
0x18cd   :  { %3849 = vmatpush3.bf16.msra.mxu0 %v4146_v23 }
0x18ce   :  { %3851 = vmatprep.subr.bf16.mxu0 %v4150_v26 }
0x18d1   :  { %3853 = vmatpush3.bf16.msra.mxu0 %v4150_v26 }
0x18d4   :  { %3421 = vmatmul.mubr.f32.vlgmr.msra.gmra.mrb[24].mxu0 %v2165_v48 }
0x1987   :  { %v3387_v49 = vpop.f32.mrb[22].mxu0 }
0x1988   :  { %2162 = vst [vmem:[#allocation7 + $0x78] sm:$0x7f] %v3387_v49  ;;  %v2151_v50 = vpop.f32.mrb[23].mxu0 }
0x1989   :  { %2161 = vst [vmem:[#allocation7 + $0x70] sm:$0xff] %v2151_v50 }
0x19a7   :  { %v3422_v51 = vpop.f32.mrb[24].mxu0 }
0x19a8   :  { %v2238_v53 = vadd.f32 %v4393_v52, %v3422_v51  ;;  %v2232_v54 = vpop.f32.mrb[25].mxu0 }
0x19a9   :  { %v2233_v55 = vadd.f32 %v4393_v52, %v2232_v54 }
0x19ab   :  { %v3854_v57 = vpack.c.bf16 %v2238_v53, %v2233_v55  ;;  %3427 = vmatprep.mubr.f32.mxu1 %v2233_v55 }
0x19ad   :  { %3855 = vmatprep.subr.bf16.mxu1 %v3854_v57 }
0x19ae   :  { %3857 = vmatpush3.bf16.xpose.msra.mxu1 %v3854_v57 }
0x19af   :  { %3860 = vmatprep.subr.msk.bf16.mxu1 %vm4166_vm4, %v3858_v56 }
0x19b5   :  { %3428 = vmatmul.mubr.f32.vlgmr.msra.gmra.mrb[24].mxu1 %v2238_v53 }
0x19b6   :  { %3863 = vmatpush3.bf16.msk.msra.mxu1 %vm4166_vm4, %v3858_v56 }
0x19b7   :  { %3865 = vmatprep.subr.bf16.mxu1 %v4121_v3 }
0x1a88   :  { %v3429_v58 = vpop.f32.mrb[24].mxu1 }
0x1a89   :  { %v2307_v59 = vpop.f32.mrb[25].mxu1  ;;  %v2319_v60 = vsel %vm222_vm1, %v3429_v58, -inf }
0x1a8a   :  { %2320 = vmax.xlane.f32.xlu1 %v2319_v60  ;;  %v2316_v61 = vsel %vm218_vm0, %v2307_v59, -inf }
0x1a8b   :  { %2317 = vmax.xlane.f32.xlu0 %v2316_v61 }
0x1b17   :  { %v2321_v62 = vpop.xlane.xlu1 %2320 }
0x1b18   :  { %v2323_v63 = vsub.f32 %v3429_v58, %v2321_v62  ;;  %v2318_v0 = vpop.xlane.xlu0 %2317 }
0x1b19   :  { %v2322_v1 = vsub.f32 %v2307_v59, %v2318_v0 }
0x1b1a   :  { %v2326_v2 = vmul.f32 1.442695, %v2323_v63 }
0x1b1b   :  { %v2324_v4 = vmul.f32 1.442695, %v2322_v1 }
0x1b1c   :  { %3976 = vpow2.f32 %v2326_v2 }
0x1b1d   :  { %3978 = vpow2.f32 %v2324_v4 }
0x1b26   :  { %v3977_v6 = vpop.eup %3976 }
0x1b27   :  { %v3979_v7 = vpop.eup %3978  ;;  %v2331_v9 = vsel %vm222_vm1, %v3977_v6, 0.0 }
0x1b28   :  { %2332 = vadd.xlane.f32.xlu1 %v2331_v9  ;;  %v2328_v10 = vsel %vm218_vm0, %v3979_v7, 0.0 }
0x1b29   :  { %2329 = vadd.xlane.f32.xlu0 %v2328_v10 }
0x1bb5   :  { %v2333_v11 = vpop.xlane.xlu1 %2332 }
0x1bb6   :  { %3980 = vrcp.f32 %v2333_v11  ;;  %v2330_v12 = vpop.xlane.xlu0 %2329 }
0x1bb7   :  { %3982 = vrcp.f32 %v2330_v12 }
0x1bc0   :  { %v3981_v13 = vpop.eup %3980 }
0x1bc1   :  { %v3983_v15 = vpop.eup %3982  ;;  %v2337_v18 = vmul.f32 %v3981_v13, %v3977_v6 }
0x1bc2   :  { %v2336_v16 = vmul.f32 %v3983_v15, %v3979_v7 }
0x1bc4   :  { %3434 = vmatprep.mubr.msk.f32.mxu1 %vm218_vm0, %v2336_v16 }
0x1bc5   :  { %3435 = vmatmul.mubr.msk.f32.vlgmr.msra.gmra.mrb[26].mxu1 %vm218_vm0, %v2337_v18 }
0x1bc6   :  { %3867 = vmatpush3.bf16.msra.mxu1 %v4121_v3  ;;  %3469 = vmatprep.mubr.f32.mxu1 %v2426_v19  ;;  %v2427_v3 = vld [vmem:[#allocation2 + $0x98] sm:$0x7f] }
0x1bc7   :  { %3869 = vmatprep.subr.bf16.mxu1 %v4123_v5  ;;  %v3900_v22 = vpack.c.bf16 %v2427_v3, %v2426_v19 }
0x1bca   :  { %3871 = vmatpush3.bf16.msra.mxu1 %v4123_v5 }
0x1bcb   :  { %3873 = vmatprep.subr.bf16.mxu1 %v4128_v8 }
0x1bce   :  { %3875 = vmatpush3.bf16.msra.mxu1 %v4128_v8 }
0x1bcf   :  { %3877 = vmatprep.subr.bf16.mxu1 %v4134_v14 }
0x1bd2   :  { %3879 = vmatpush3.bf16.msra.mxu1 %v4134_v14 }
0x1bd3   :  { %3881 = vmatprep.subr.bf16.mxu1 %v4138_v17 }
0x1bd6   :  { %3883 = vmatpush3.bf16.msra.mxu1 %v4138_v17 }
0x1bd7   :  { %3885 = vmatprep.subr.bf16.mxu1 %v4142_v20 }
0x1bda   :  { %3887 = vmatpush3.bf16.msra.mxu1 %v4142_v20 }
0x1bdb   :  { %3889 = vmatprep.subr.bf16.mxu1 %v4146_v23 }
0x1bde   :  { %3891 = vmatpush3.bf16.msra.mxu1 %v4146_v23 }
0x1bdf   :  { %3893 = vmatprep.subr.bf16.mxu1 %v4150_v26 }
0x1be2   :  { %3895 = vmatpush3.bf16.msra.mxu1 %v4150_v26 }
0x1be5   :  { %3470 = vmatmul.mubr.f32.vlgmr.msra.gmra.mrb[28].mxu1 %v2427_v3 }
0x1c98   :  { %v3436_v5 = vpop.f32.mrb[26].mxu1 }
0x1c99   :  { %2424 = vst [vmem:[#allocation7 + $0x88] sm:$0x7f] %v3436_v5  ;;  %v2413_v8 = vpop.f32.mrb[27].mxu1 }
0x1c9a   :  { %2423 = vst [vmem:[#allocation7 + $0x80] sm:$0xff] %v2413_v8 }
0x1cb8   :  { %v3471_v14 = vpop.f32.mrb[28].mxu1 }
0x1cb9   :  { %v2500_v17 = vadd.f32 %v4393_v52, %v3471_v14  ;;  %v2494_v21 = vpop.f32.mrb[29].mxu1 }
0x1cba   :  { %v2495_v20 = vadd.f32 %v4393_v52, %v2494_v21 }
0x1cbc   :  { %v3896_v24 = vpack.c.bf16 %v2500_v17, %v2495_v20  ;;  %3476 = vmatprep.mubr.f32.mxu0 %v2495_v20 }
0x1cbe   :  { %3897 = vmatprep.subr.bf16.mxu0 %v3896_v24 }
0x1cbf   :  { %3899 = vmatpush3.bf16.xpose.msra.mxu0 %v3896_v24 }
0x1cc0   :  { %3902 = vmatprep.subr.msk.bf16.mxu0 %vm4166_vm4, %v3900_v22 }
0x1cc6   :  { %3477 = vmatmul.mubr.f32.vlgmr.msra.gmra.mrb[26].mxu0 %v2500_v17 }
0x1cc7   :  { %3905 = vmatpush3.bf16.msk.msra.mxu0 %vm4166_vm4, %v3900_v22 }
0x1d99   :  { %v3478_v23 = vpop.f32.mrb[26].mxu0 }
0x1d9a   :  { %v2569_v26 = vpop.f32.mrb[27].mxu0  ;;  %v2581_v25 = vsel %vm222_vm1, %v3478_v23, -inf }
0x1d9b   :  { %2582 = vmax.xlane.f32.xlu1 %v2581_v25  ;;  %v2578_v28 = vsel %vm218_vm0, %v2569_v26, -inf }
0x1d9c   :  { %2579 = vmax.xlane.f32.xlu0 %v2578_v28 }
0x1e28   :  { %v2583_v29 = vpop.xlane.xlu1 %2582 }
0x1e29   :  { %v2585_v27 = vsub.f32 %v3478_v23, %v2583_v29  ;;  %v2580_v30 = vpop.xlane.xlu0 %2579 }
0x1e2a   :  { %v2584_v31 = vsub.f32 %v2569_v26, %v2580_v30 }
0x1e2b   :  { %v2588_v32 = vmul.f32 1.442695, %v2585_v27 }
0x1e2c   :  { %v2586_v33 = vmul.f32 1.442695, %v2584_v31 }
0x1e2d   :  { %3984 = vpow2.f32 %v2588_v32 }
0x1e2e   :  { %3986 = vpow2.f32 %v2586_v33 }
0x1e37   :  { %v3985_v34 = vpop.eup %3984 }
0x1e38   :  { %v3987_v35 = vpop.eup %3986  ;;  %v2593_v47 = vsel %vm222_vm1, %v3985_v34, 0.0 }
0x1e39   :  { %2594 = vadd.xlane.f32.xlu1 %v2593_v47  ;;  %v2590_v36 = vsel %vm218_vm0, %v3987_v35, 0.0 }
0x1e3a   :  { %2591 = vadd.xlane.f32.xlu0 %v2590_v36 }
0x1ec6   :  { %v2595_v37 = vpop.xlane.xlu1 %2594 }
0x1ec7   :  { %3988 = vrcp.f32 %v2595_v37  ;;  %v2592_v38 = vpop.xlane.xlu0 %2591 }
0x1ec8   :  { %3990 = vrcp.f32 %v2592_v38 }
0x1ed1   :  { %v3989_v39 = vpop.eup %3988 }
0x1ed2   :  { %v3991_v40 = vpop.eup %3990  ;;  %v2599_v42 = vmul.f32 %v3989_v39, %v3985_v34 }
0x1ed3   :  { %v2598_v41 = vmul.f32 %v3991_v40, %v3987_v35 }
0x1ed5   :  { %3483 = vmatprep.mubr.msk.f32.mxu0 %vm218_vm0, %v2598_v41 }
0x1ed6   :  { %3484 = vmatmul.mubr.msk.f32.vlgmr.msra.gmra.mrb[28].mxu0 %vm218_vm0, %v2599_v42 }
0x1fa9   :  { %v3485_v43 = vpop.f32.mrb[28].mxu0 }
0x1faa   :  { %2686 = vst [vmem:[#allocation7 + $0x98] sm:$0x7f] %v3485_v43  ;;  %v2675_v44 = vpop.f32.mrb[29].mxu0 }
0x1fab   :  { %2685 = vst [vmem:[#allocation7 + $0x90] sm:$0xff] %v2675_v44 }
0x1fac   :  { %4048 = shalt.err (!%p4045_p6)
}
0x1fad   :  { %s4049_s17 = scalar_lea.hbm %s4453_s3, 2560 }
0x1fae   :  { %p4050_p7 = scmp.ne.s32.totalorder %s4453_s3, %s4049_s17  ;;  %p4053_p8 = scmp.lt.u32.totalorder %s4049_s17, %s4453_s3 }
0x1fb0   :  { %p4055_p9 = pnand %p4053_p8, %p4050_p7 }
0x1fb2   :  { %4058 = shalt.err (!%p4055_p9)
}
0x1fb3   :  { %2698 = dma.vmem_to_hbm [thread:$0]  %s2693_s13, 2560, %s4453_s3, [#allocation4], %s4066_s22, %s4066_s22, %s4067_s23  }
0x1fb4   :  { %4063 = dma.done.wait [#allocation4], 2560  }
0x1fb5   :  { %4064 = vsyncadd [#allocation4], 4294964736 }
0x1fb6   :  { %2702 = vsyncpa [#allocation3], 1 }
0x1fb7   :  { %2703 = vsyncpa [#allocation6], 1 }
0x1fb8   :  { %2704 = vsyncpa [#allocation4], 1 }

</bundles_post_ra>
